<compile_context>
chip_gen: v5e
topology: v5e:2x2
jax: 0.10.0
libtpu: 0.0.40
codegen_flags: <defaults>
</compile_context>

<pallas_src>
import functools

import jax
import jax.numpy as jnp
from jax.experimental import pallas as pl
from jax.experimental.pallas import tpu as pltpu


# ---------------------------------------------------------------------------
# small helpers
# ---------------------------------------------------------------------------
def _round_up(x, m):
    return ((x + m - 1) // m) * m


def _lane_pad(c, multiple=None):
    """Pad a channel count for lane density.  Auto: only when it costs <= ~33% extra."""
    if multiple is not None:
        return _round_up(c, multiple)
    if c % 128 == 0 or c < 96:
        return c
    return _round_up(c, 128)


def _pad_last(a, c):
    if a.shape[-1] == c:
        return a
    pad = [(0, 0)] * (a.ndim - 1) + [(0, c - a.shape[-1])]
    return jnp.pad(a, pad)


def _pad2(a, rows, cols):
    return jnp.pad(a, ((0, rows - a.shape[0]), (0, cols - a.shape[1])))


@functools.lru_cache(maxsize=1)
def _vmem_limit():
    # generation-aware scoped-VMEM limit: ~64 MiB on v5e/v6e (128 MiB physical),
    # ~32 MiB on v7x (64 MiB physical); conservative fallback if the query fails.
    try:
        cap = int(pltpu.get_tpu_info().vmem_capacity_bytes)
        return max(32 * 1024 * 1024, min(cap // 2, 96 * 1024 * 1024))
    except Exception:
        return 32 * 1024 * 1024


def _compiler_params(semantics):
    return pltpu.CompilerParams(dimension_semantics=semantics,
                                vmem_limit_bytes=_vmem_limit())


def _row_tile(hout, wout, chp, budget):
    """Largest divisor TH of Hout whose f32 accumulator (TH, Wout, Chp) fits `budget` bytes."""
    best = 1
    for t in range(1, hout + 1):
        if hout % t == 0 and t * wout * chp * 4 <= budget:
            best = t
    return best


def _apply_act(x, act):
    if act == "hswish":                     # x * relu6(x + 3) / 6
        return x * jnp.clip(x + 3.0, 0.0, 6.0) * (1.0 / 6.0)
    if act == "relu":
        return jnp.maximum(x, 0.0)
    return x


def _fold_bn(gamma, beta, mean, var, eps):
    scale = gamma / jnp.sqrt(var + eps)
    bias = beta - mean * scale
    return (scale.reshape(1, -1).astype(jnp.float32),
            bias.reshape(1, -1).astype(jnp.float32))


# ---------------------------------------------------------------------------
# Kernel A: fused [1x1 expansion + BN + act] + depthwise KxK + BN (+act) + SE pool
# ---------------------------------------------------------------------------
def _fused_dw_kernel(*refs, stride, ksize, expand, act, act_after_dw, has_pool):
    idx = 0
    x_ref = refs[idx]; idx += 1
    if expand:
        w1_ref, s1_ref, b1_ref, mask_ref = refs[idx:idx + 4]; idx += 4
    wd_ref, sd_ref, bd_ref = refs[idx:idx + 3]; idx += 3
    o_ref = refs[idx]; idx += 1
    pool_ref = None
    if has_pool:
        pool_ref = refs[idx]; idx += 1
    hid_ref = refs[idx] if expand else None

    TH, Wout, ChP = o_ref.shape[1], o_ref.shape[2], o_ref.shape[3]
    Wp = x_ref.shape[2]
    h = pl.program_id(1)
    r0 = pl.multiple_of(h * (TH * stride), TH * stride)   # first padded-input row of this tile
    RW = (TH - 1) * stride + ksize                        # input rows needed (halo window)

    if expand:
        # 1x1 expansion over the halo window as one MXU matmul; hidden stays f32 in VMEM.
        cin = x_ref.shape[3]
        xw = x_ref[0, pl.ds(r0, RW), :, :].reshape(RW * Wp, cin)     # Wp % 8 == 0 -> free
        hid = jnp.dot(xw.astype(w1_ref.dtype), w1_ref[...],
                      preferred_element_type=jnp.float32)            # (RW*Wp, ChP)
        hid = hid * s1_ref[...] + b1_ref[...]                        # folded BN (f32)
        hid = _apply_act(hid, act)
        hid = hid * mask_ref[pl.ds(r0 * Wp, RW * Wp), :]             # zero the padding rows/cols
        hid_ref[...] = hid.reshape(RW, Wp, ChP)

    def tap(kh, kw):
        if expand:
            if stride == 1:
                return hid_ref[pl.ds(kh, TH), pl.ds(kw, Wout), :]
            return hid_ref[pl.ds(kh, TH, stride), pl.ds(kw, Wout, stride), :]
        if stride == 1:
            return x_ref[0, pl.ds(r0 + kh, TH), pl.ds(kw, Wout), :]
        return x_ref[0, pl.ds(r0 + kh, TH, stride), pl.ds(kw, Wout, stride), :]

    # depthwise KxK: per-tap VPU MACs, accumulator in f32 output layout (TH, Wout, ChP)
    acc = None
    for kh in range(ksize):
        for kw in range(ksize):
            term = tap(kh, kw).astype(jnp.float32) * \
                   wd_ref[kh * ksize + kw].astype(jnp.float32)
            acc = term if acc is None else acc + term

    y = acc * sd_ref[...] + bd_ref[...]                              # folded BN (f32)
    if act_after_dw:
        y = _apply_act(y, act)

    if has_pool:
        @pl.when(h == 0)
        def _():
            pool_ref[...] = jnp.zeros_like(pool_ref)
        pool_ref[...] += jnp.sum(y, axis=(0, 1), keepdims=True)      # SE global sum (f32)

    o_ref[0] = y.astype(o_ref.dtype)


def _fused_expand_dwconv(x_pad, expand_params, mask, dw_params, *, stride, ksize,
                         Hout, Wout, act, act_after_dw, use_se, cdt, row_budget):
    N, Hp, Wp, CinP = x_pad.shape
    wd, sd, bd = dw_params
    ChP = wd.shape[-1]
    TH = _row_tile(Hout, Wout, ChP, row_budget)
    nH = Hout // TH
    RW = (TH - 1) * stride + ksize
    expand = expand_params is not None

    inputs = [x_pad]
    in_specs = [pl.BlockSpec((1, Hp, Wp, CinP), lambda n, h: (n, 0, 0, 0))]
    if expand:
        w1, s1, b1 = expand_params
        inputs += [w1, s1, b1, mask]
        in_specs += [
            pl.BlockSpec((CinP, ChP), lambda n, h: (0, 0)),
            pl.BlockSpec((1, ChP), lambda n, h: (0, 0)),
            pl.BlockSpec((1, ChP), lambda n, h: (0, 0)),
            pl.BlockSpec((Hp * Wp, 1), lambda n, h: (0, 0)),
        ]
    inputs += [wd, sd, bd]
    in_specs += [
        pl.BlockSpec((ksize * ksize, 1, ChP), lambda n, h: (0, 0, 0)),
        pl.BlockSpec((1, ChP), lambda n, h: (0, 0)),
        pl.BlockSpec((1, ChP), lambda n, h: (0, 0)),
    ]

    z_spec = pl.BlockSpec((1, TH, Wout, ChP), lambda n, h: (n, h, 0, 0))
    if use_se:
        out_shape = (jax.ShapeDtypeStruct((N, Hout, Wout, ChP), cdt),
                     jax.ShapeDtypeStruct((N, 1, ChP), jnp.float32))
        out_specs = [z_spec, pl.BlockSpec((1, 1, ChP), lambda n, h: (n, 0, 0))]
    else:
        out_shape = jax.ShapeDtypeStruct((N, Hout, Wout, ChP), cdt)
        out_specs = z_spec

    scratch = [pltpu.VMEM((RW, Wp, ChP), jnp.float32)] if expand else []

    kernel = functools.partial(_fused_dw_kernel, stride=stride, ksize=ksize,
                               expand=expand, act=act,
                               act_after_dw=act_after_dw, has_pool=use_se)
    # the SE pool output accumulates across row tiles -> h axis must be sequential
    semantics = ("parallel", "arbitrary" if use_se else "parallel")

    outs = pl.pallas_call(
        kernel,
        out_shape=out_shape,
        grid_spec=pltpu.PrefetchScalarGridSpec(
            num_scalar_prefetch=0,
            grid=(N, nH),
            in_specs=in_specs,
            out_specs=out_specs,
            scratch_shapes=scratch),
        compiler_params=_compiler_params(semantics),
    )(*inputs)

    if use_se:
        return outs[0], outs[1]
    return outs, None


# ---------------------------------------------------------------------------
# Kernel B: 1x1 projection conv + BN (+SE gate, +act, +identity residual)
# ---------------------------------------------------------------------------
def _project_kernel(*refs, act, has_gate, has_res):
    x_ref, w_ref, s_ref, b_ref = refs[:4]
    k = 4
    gate_ref = res_ref = None
    if has_gate:
        gate_ref = refs[k]; k += 1
    if has_res:
        res_ref = refs[k]; k += 1
    o_ref = refs[k]

    xv = x_ref[0]                                         # (TM, ChP), compute dtype
    if has_gate:
        xv = xv * gate_ref[0]                             # SE gate (per-image, per-channel)
    xv = _apply_act(xv, act)                              # pre-matmul act in compute dtype
    y = jnp.dot(xv.astype(w_ref.dtype), w_ref[...],
                preferred_element_type=jnp.float32)       # MXU matmul, K = hidden_dim
    y = y * s_ref[...] + b_ref[...]                       # folded BN (f32)
    if has_res:
        y = y + res_ref[0].astype(jnp.float32)            # identity skip connection
    o_ref[0] = y.astype(o_ref.dtype)


def _project(z2, w, scale, bias, *, act, gate, residual, out_dtype, m_target=1024):
    N, M, ChP = z2.shape
    OupP = w.shape[1]
    TM = min(m_target, _round_up(M, 8))
    Mp = _round_up(M, TM)
    if Mp != M:                                            # cdiv grid: pad the row tail
        z2 = jnp.pad(z2, ((0, 0), (0, Mp - M), (0, 0)))
        if residual is not None:
            residual = jnp.pad(residual, ((0, 0), (0, Mp - M), (0, 0)))
    nM = Mp // TM

    inputs = [z2, w, scale, bias]
    in_specs = [
        pl.BlockSpec((1, TM, ChP), lambda n, m: (n, m, 0)),
        pl.BlockSpec((ChP, OupP), lambda n, m: (0, 0)),
        pl.BlockSpec((1, OupP), lambda n, m: (0, 0)),
        pl.BlockSpec((1, OupP), lambda n, m: (0, 0)),
    ]
    if gate is not None:
        inputs.append(gate)
        in_specs.append(pl.BlockSpec((1, 1, ChP), lambda n, m: (n, 0, 0)))
    if residual is not None:
        inputs.append(residual)
        in_specs.append(pl.BlockSpec((1, TM, OupP), lambda n, m: (n, m, 0)))

    kernel = functools.partial(_project_kernel, act=act,
                               has_gate=gate is not None,
                               has_res=residual is not None)
    return pl.pallas_call(
        kernel,
        out_shape=jax.ShapeDtypeStruct((N, Mp, OupP), out_dtype),
        grid_spec=pltpu.PrefetchScalarGridSpec(
            num_scalar_prefetch=0,
            grid=(N, nM),
            in_specs=in_specs,
            out_specs=pl.BlockSpec((1, TM, OupP), lambda n, m: (n, m, 0))),
        compiler_params=_compiler_params(("parallel", "parallel")),
    )(*inputs)


# ---------------------------------------------------------------------------
# InvertedResidual.forward
# ---------------------------------------------------------------------------
def inverted_residual_forward(x, p, *, stride, kernel_size, use_se, use_hs,
                              use_bf16=True, eps=1e-5, lane_multiple=None,
                              row_budget=128 * 1024, m_tile=1024):
    """x: (N, inp, H, W) float32 NCHW -> (N, oup, Hout, Wout) float32 NCHW."""
    N, Cin, H, W = x.shape
    hidden = p["dw_w"].shape[0]
    oup = p["pwl_w"].shape[0]
    pad = (kernel_size - 1) // 2
    Hout = (H + 2 * pad - kernel_size) // stride + 1
    Wout = (W + 2 * pad - kernel_size) // stride + 1
    identity = (stride == 1 and Cin == oup)
    act = "hswish" if use_hs else "relu"
    cdt = jnp.bfloat16 if use_bf16 else jnp.float32
    expand = "pw_w" in p                                   # inp != hidden_dim branch

    # lane-padded channel counts (lane-dense stores when it is cheap to do so)
    CinP = _lane_pad(Cin, lane_multiple)
    ChP = _lane_pad(hidden, lane_multiple)
    OupP = _lane_pad(oup, lane_multiple)

    # NHWC, channel pad, spatial zero pad; Wp rounded up to a multiple of 8 so the in-kernel
    # (RW, Wp, C) <-> (RW*Wp, C) regroup is sublane-aligned (extra columns are never read).
    Hp = H + 2 * pad
    Wp = max(_round_up(W + 2 * pad, 8), W + 2 * pad)
    x_nhwc = _pad_last(jnp.transpose(x, (0, 2, 3, 1)), CinP)          # (N, H, W, CinP) f32
    x_padded = jnp.pad(x_nhwc, ((0, 0), (pad, pad), (pad, Wp - W - pad), (0, 0))).astype(cdt)

    # --- expansion (1x1) params + interior mask ------------------------------
    expand_params = mask = None
    if expand:
        w1 = jnp.transpose(p["pw_w"].reshape(hidden, Cin), (1, 0))     # (Cin, hidden)
        w1 = _pad2(w1, CinP, ChP).astype(cdt)
        s1, b1 = _fold_bn(*p["pw_bn"], eps)
        s1, b1 = _pad_last(s1, ChP), _pad_last(b1, ChP)
        expand_params = (w1, s1, b1)
        rows = jnp.arange(Hp); cols = jnp.arange(Wp)
        mrow = (rows >= pad) & (rows < pad + H)
        mcol = (cols >= pad) & (cols < pad + W)
        mask = (mrow[:, None] & mcol[None, :]).astype(jnp.float32).reshape(Hp * Wp, 1)

    # --- depthwise params -----------------------------------------------------
    wd = jnp.transpose(p["dw_w"].reshape(hidden, kernel_size * kernel_size), (1, 0))
    wd = _pad_last(wd.reshape(kernel_size * kernel_size, 1, hidden), ChP).astype(cdt)
    sd, bd = _fold_bn(*p["dw_bn"], eps)
    sd, bd = _pad_last(sd, ChP), _pad_last(bd, ChP)

    # --- Kernel A: expansion + depthwise + BN (+act) + SE pool ----------------
    z, pool = _fused_expand_dwconv(
        x_padded, expand_params, mask, (wd, sd, bd),
        stride=stride, ksize=kernel_size, Hout=Hout, Wout=Wout,
        act=act, act_after_dw=not expand, use_se=use_se, cdt=cdt, row_budget=row_budget)
    z2 = z.reshape(N, Hout * Wout, ChP)

    # --- SE gate: tiny FC -> ReLU -> FC -> h_sigmoid in plain JAX -------------
    gate = None
    if use_se:
        mean = pool[:, 0, :hidden] * (1.0 / (Hout * Wout))             # (N, hidden) f32
        h1 = jnp.maximum(mean @ p["se_w1"].T + p["se_b1"], 0.0)
        h2 = h1 @ p["se_w2"].T + p["se_b2"]
        g = jnp.clip(h2 + 3.0, 0.0, 6.0) * (1.0 / 6.0)
        gate = _pad_last(g, ChP).reshape(N, 1, ChP).astype(cdt)

    # --- Kernel B: 1x1 projection + BN (+gate, +act, +identity) ---------------
    w2 = jnp.transpose(p["pwl_w"].reshape(oup, hidden), (1, 0))        # (hidden, oup)
    w2 = _pad2(w2, ChP, OupP).astype(cdt)
    s2, b2 = _fold_bn(*p["pwl_bn"], eps)
    s2, b2 = _pad_last(s2, OupP), _pad_last(b2, OupP)
    pre_act = act if expand else "none"                    # expand branch: act after SE gate
    res = x_nhwc.reshape(N, H * W, CinP) if identity else None
    y = _project(z2, w2, s2, b2, act=pre_act, gate=gate, residual=res,
                 out_dtype=jnp.float32, m_target=m_tile)

    y = y[:, :Hout * Wout, :oup].reshape(N, Hout, Wout, oup)
    return jnp.transpose(y, (0, 3, 1, 2))


# ---------------------------------------------------------------------------
# Pure-JAX reference (mirrors the PyTorch module) and test harness
# ---------------------------------------------------------------------------
def _reference(x, p, *, stride, kernel_size, use_se, use_hs, eps=1e-5):
    hp = jax.lax.Precision.HIGHEST

    def bn(y, g, b, m, v):
        s = g / jnp.sqrt(v + eps)
        return y * s[None, :, None, None] + (b - m * s)[None, :, None, None]

    def act(y):
        return y * jnp.clip(y + 3.0, 0.0, 6.0) / 6.0 if use_hs else jnp.maximum(y, 0.0)

    def se(y):
        m = jnp.mean(y, axis=(2, 3))
        h1 = jnp.maximum(m @ p["se_w1"].T + p["se_b1"], 0.0)
        h2 = h1 @ p["se_w2"].T + p["se_b2"]
        g = jnp.clip(h2 + 3.0, 0.0, 6.0) / 6.0
        return y * g[:, :, None, None]

    def conv(y, w, s, groups=1, padding=0):
        return jax.lax.conv_general_dilated(
            y, w, (s, s), ((padding, padding), (padding, padding)),
            dimension_numbers=("NCHW", "OIHW", "NCHW"),
            feature_group_count=groups, precision=hp)

    inp = x.shape[1]
    hidden = p["dw_w"].shape[0]
    oup = p["pwl_w"].shape[0]
    pad = (kernel_size - 1) // 2

    y = x
    if "pw_w" in p:
        y = act(bn(conv(y, p["pw_w"], 1), *p["pw_bn"]))
        y = bn(conv(y, p["dw_w"], stride, groups=hidden, padding=pad), *p["dw_bn"])
        if use_se:
            y = se(y)
        y = act(y)
    else:
        y = act(bn(conv(y, p["dw_w"], stride, groups=hidden, padding=pad), *p["dw_bn"]))
        if use_se:
            y = se(y)
    y = bn(conv(y, p["pwl_w"], 1), *p["pwl_bn"])
    if stride == 1 and inp == oup:
        y = x + y
    return y


def make_params(key, inp, oup, hidden, k, use_se):
    keys = jax.random.split(key, 10)

    def bn_init(c, kk):
        kg, kb, km, kv = jax.random.split(kk, 4)
        return (1.0 + 0.1 * jax.random.normal(kg, (c,), jnp.float32),
                0.1 * jax.random.normal(kb, (c,), jnp.float32),
                0.1 * jax.random.normal(km, (c,), jnp.float32),
                jnp.abs(1.0 + 0.1 * jax.random.normal(kv, (c,), jnp.float32)))

    p = {}
    if inp != hidden:
        p["pw_w"] = 0.2 * jax.random.normal(keys[0], (hidden, inp, 1, 1), jnp.float32)
        p["pw_bn"] = bn_init(hidden, keys[1])
    p["dw_w"] = 0.2 * jax.random.normal(keys[2], (hidden, 1, k, k), jnp.float32)
    p["dw_bn"] = bn_init(hidden, keys[3])
    if use_se:
        cr = max(hidden // 4, 1)
        p["se_w1"] = 0.3 * jax.random.normal(keys[4], (cr, hidden), jnp.float32)
        p["se_b1"] = 0.1 * jax.random.normal(keys[5], (cr,), jnp.float32)
        p["se_w2"] = 0.3 * jax.random.normal(keys[6], (hidden, cr), jnp.float32)
        p["se_b2"] = 0.1 * jax.random.normal(keys[7], (hidden,), jnp.float32)
    p["pwl_w"] = 0.2 * jax.random.normal(keys[8], (oup, hidden, 1, 1), jnp.float32)
    p["pwl_bn"] = bn_init(oup, keys[9])
    return p


if __name__ == "__main__":
    key = jax.random.PRNGKey(0)
    N = 2
    configs = [
        # expansion branch, SE, h_swish, stride 1, identity skip; small row budget to force
        # several row tiles (exercises the halo windows + the accumulated SE pool); f32.
        dict(inp=8, oup=8, hidden=16, k=3, stride=1, use_se=True, use_hs=True,
             H=16, W=16, use_bf16=False, tol=5e-3, row_budget=4096, lane_multiple=None),
        # expansion branch, no SE, ReLU, stride 2 (strided pl.ds taps); bf16.
        dict(inp=4, oup=8, hidden=16, k=3, stride=2, use_se=False, use_hs=False,
             H=16, W=16, use_bf16=True, tol=6e-2, row_budget=128 * 1024, lane_multiple=None),
        # inp == hidden_dim branch (no expansion), SE, h_swish, identity skip; forced channel
        # padding exercises the lane-dense padding path; bf16.
        dict(inp=8, oup=8, hidden=8, k=3, stride=1, use_se=True, use_hs=True,
             H=16, W=16, use_bf16=True, tol=6e-2, row_budget=128 * 1024, lane_multiple=32),
    ]
    for ci, cfg in enumerate(configs):
        kx, kp, key = jax.random.split(key, 3)
        x = jax.random.normal(kx, (N, cfg["inp"], cfg["H"], cfg["W"]), jnp.float32)
        p = make_params(kp, cfg["inp"], cfg["oup"], cfg["hidden"], cfg["k"], cfg["use_se"])
        ref = _reference(x, p, stride=cfg["stride"], kernel_size=cfg["k"],
                         use_se=cfg["use_se"], use_hs=cfg["use_hs"])
        out = inverted_residual_forward(
            x, p, stride=cfg["stride"], kernel_size=cfg["k"],
            use_se=cfg["use_se"], use_hs=cfg["use_hs"],
            use_bf16=cfg["use_bf16"], row_budget=cfg["row_budget"],
            lane_multiple=cfg["lane_multiple"])
        out = jax.block_until_ready(out)
        assert out.shape == ref.shape, (ci, out.shape, ref.shape)
        max_err = float(jnp.max(jnp.abs(out - ref)))
        assert jnp.allclose(out, ref, atol=cfg["tol"], rtol=cfg["tol"]), (
            f"config {ci} max_abs_err={max_err}")
    print("KERNEL_OK")
</pallas_src>

<mosaic_0001>
module attributes {stable_mosaic.version = 11 : i64} {
  func.func @_fused_dw_kernel(%arg0: i32, %arg1: i32, %arg2: memref<1x18x24x8xf32, #tpu.memory_space<vmem>>, %arg3: memref<8x16xf32, #tpu.memory_space<vmem>>, %arg4: memref<1x16xf32, #tpu.memory_space<vmem>>, %arg5: memref<1x16xf32, #tpu.memory_space<vmem>>, %arg6: memref<432x1xf32, #tpu.memory_space<vmem>>, %arg7: memref<9x1x16xf32, #tpu.memory_space<vmem>>, %arg8: memref<1x16xf32, #tpu.memory_space<vmem>>, %arg9: memref<1x16xf32, #tpu.memory_space<vmem>>, %arg10: memref<1x4x16x16xf32, #tpu.memory_space<vmem>>, %arg11: memref<1x1x16xf32, #tpu.memory_space<vmem>>, %arg12: memref<6x24x16xf32, #tpu.memory_space<vmem>>) attributes {dimension_semantics = [#tpu.dimension_semantics<parallel>, #tpu.dimension_semantics<arbitrary>], iteration_bounds = array<i64: 2, 4>, scalar_prefetch = 0 : i64, scratch_operands = 1 : i64, tpu.core_type = #tpu.core_type<tc>, window_params = [{transform_indices = @transform_0, window_bounds = array<i64: 1, 18, 24, 8>}, {pipeline_mode = #tpu.pipeline_mode<synchronous>, transform_indices = @transform_1, window_bounds = array<i64: 8, 16>}, {pipeline_mode = #tpu.pipeline_mode<synchronous>, transform_indices = @transform_2, window_bounds = array<i64: 1, 16>}, {pipeline_mode = #tpu.pipeline_mode<synchronous>, transform_indices = @transform_3, window_bounds = array<i64: 1, 16>}, {pipeline_mode = #tpu.pipeline_mode<synchronous>, transform_indices = @transform_4, window_bounds = array<i64: 432, 1>}, {pipeline_mode = #tpu.pipeline_mode<synchronous>, transform_indices = @transform_5, window_bounds = array<i64: 9, 1, 16>}, {pipeline_mode = #tpu.pipeline_mode<synchronous>, transform_indices = @transform_6, window_bounds = array<i64: 1, 16>}, {pipeline_mode = #tpu.pipeline_mode<synchronous>, transform_indices = @transform_7, window_bounds = array<i64: 1, 16>}, {transform_indices = @transform_8, window_bounds = array<i64: 1, 4, 16, 16>}, {transform_indices = @transform_9, window_bounds = array<i64: 1, 1, 16>}]} {
    %c4_i32 = arith.constant 4 : i32
    %0 = arith.muli %arg1, %c4_i32 : i32
    %1 = tpu.assume_multiple %0, 4 : i32
    %c0 = arith.constant 0 : index
    %2 = arith.index_cast %1 : i32 to index
    %c0_0 = arith.constant 0 : index
    %c0_1 = arith.constant 0 : index
    %3 = vector.load %arg2[%c0, %2, %c0_0, %c0_1] : memref<1x18x24x8xf32, #tpu.memory_space<vmem>>, vector<1x6x24x8xf32>
    %4 = vector.shape_cast %3 : vector<1x6x24x8xf32> to vector<6x24x8xf32>
    %5 = vector.shape_cast %4 : vector<6x24x8xf32> to vector<144x8xf32>
    %c0_2 = arith.constant 0 : index
    %c0_3 = arith.constant 0 : index
    %6 = vector.load %arg3[%c0_2, %c0_3] : memref<8x16xf32, #tpu.memory_space<vmem>>, vector<8x16xf32>
    %cst = arith.constant dense<0.000000e+00> : vector<144x16xf32>
    %7 = tpu.matmul %5, %6, %cst {dimension_numbers = #tpu.dot_dimension_numbers<[1], [0], [0], [1], [0, 0, 1, 1], [], []>} : vector<144x8xf32>, vector<8x16xf32>, vector<144x16xf32> -> vector<144x16xf32>
    %c0_4 = arith.constant 0 : index
    %c0_5 = arith.constant 0 : index
    %8 = vector.load %arg4[%c0_4, %c0_5] : memref<1x16xf32, #tpu.memory_space<vmem>>, vector<1x16xf32>
    %9 = vector.broadcast %8 : vector<1x16xf32> to vector<144x16xf32>
    %10 = arith.mulf %7, %9 : vector<144x16xf32>
    %c0_6 = arith.constant 0 : index
    %c0_7 = arith.constant 0 : index
    %11 = vector.load %arg5[%c0_6, %c0_7] : memref<1x16xf32, #tpu.memory_space<vmem>>, vector<1x16xf32>
    %12 = vector.broadcast %11 : vector<1x16xf32> to vector<144x16xf32>
    %13 = arith.addf %10, %12 : vector<144x16xf32>
    %cst_8 = arith.constant 3.000000e+00 : f32
    %14 = vector.broadcast %cst_8 : f32 to vector<144x16xf32>
    %15 = arith.addf %13, %14 : vector<144x16xf32>
    %cst_9 = arith.constant 0.000000e+00 : f32
    %cst_10 = arith.constant 6.000000e+00 : f32
    %16 = vector.broadcast %cst_9 : f32 to vector<144x16xf32>
    %17 = arith.maximumf %16, %15 : vector<144x16xf32>
    %18 = vector.broadcast %cst_10 : f32 to vector<144x16xf32>
    %19 = arith.minimumf %18, %17 : vector<144x16xf32>
    %20 = arith.mulf %13, %19 : vector<144x16xf32>
    %cst_11 = arith.constant 0.166666672 : f32
    %21 = vector.broadcast %cst_11 : f32 to vector<144x16xf32>
    %22 = arith.mulf %20, %21 : vector<144x16xf32>
    %c24_i32 = arith.constant 24 : i32
    %23 = arith.muli %1, %c24_i32 : i32
    %24 = arith.index_cast %23 : i32 to index
    %c0_12 = arith.constant 0 : index
    %25 = vector.load %arg6[%24, %c0_12] : memref<432x1xf32, #tpu.memory_space<vmem>>, vector<144x1xf32>
    %26 = vector.broadcast %25 : vector<144x1xf32> to vector<144x16xf32>
    %27 = arith.mulf %22, %26 : vector<144x16xf32>
    %28 = vector.shape_cast %27 : vector<144x16xf32> to vector<6x24x16xf32>
    %c0_13 = arith.constant 0 : index
    %c0_14 = arith.constant 0 : index
    %c0_15 = arith.constant 0 : index
    %29 = vector.load %arg12[%c0_13, %c0_14, %c0_15] : memref<6x24x16xf32, #tpu.memory_space<vmem>>, vector<6x24x16xf32>
    tpu.vector_store %arg12[%c0_13, %c0_14, %c0_15], %28 {strides = array<i32>} : memref<6x24x16xf32, #tpu.memory_space<vmem>>, vector<6x24x16xf32>,
    %c0_16 = arith.constant 0 : index
    %c0_17 = arith.constant 0 : index
    %c0_18 = arith.constant 0 : index
    %30 = vector.load %arg12[%c0_16, %c0_17, %c0_18] : memref<6x24x16xf32, #tpu.memory_space<vmem>>, vector<4x16x16xf32>
    %c0_19 = arith.constant 0 : index
    %c0_20 = arith.constant 0 : index
    %c0_21 = arith.constant 0 : index
    %31 = vector.load %arg7[%c0_19, %c0_20, %c0_21] : memref<9x1x16xf32, #tpu.memory_space<vmem>>, vector<1x1x16xf32>
    %32 = vector.shape_cast %31 : vector<1x1x16xf32> to vector<1x16xf32>
    %33 = vector.shape_cast %32 : vector<1x16xf32> to vector<1x1x16xf32>
    %34 = vector.broadcast %33 : vector<1x1x16xf32> to vector<4x16x16xf32>
    %35 = arith.mulf %30, %34 : vector<4x16x16xf32>
    %c0_22 = arith.constant 0 : index
    %c1 = arith.constant 1 : index
    %c0_23 = arith.constant 0 : index
    %36 = vector.load %arg12[%c0_22, %c1, %c0_23] : memref<6x24x16xf32, #tpu.memory_space<vmem>>, vector<4x16x16xf32>
    %c1_24 = arith.constant 1 : index
    %c0_25 = arith.constant 0 : index
    %c0_26 = arith.constant 0 : index
    %37 = vector.load %arg7[%c1_24, %c0_25, %c0_26] : memref<9x1x16xf32, #tpu.memory_space<vmem>>, vector<1x1x16xf32>
    %38 = vector.shape_cast %37 : vector<1x1x16xf32> to vector<1x16xf32>
    %39 = vector.shape_cast %38 : vector<1x16xf32> to vector<1x1x16xf32>
    %40 = vector.broadcast %39 : vector<1x1x16xf32> to vector<4x16x16xf32>
    %41 = arith.mulf %36, %40 : vector<4x16x16xf32>
    %42 = arith.addf %35, %41 : vector<4x16x16xf32>
    %c0_27 = arith.constant 0 : index
    %c2 = arith.constant 2 : index
    %c0_28 = arith.constant 0 : index
    %43 = vector.load %arg12[%c0_27, %c2, %c0_28] : memref<6x24x16xf32, #tpu.memory_space<vmem>>, vector<4x16x16xf32>
    %c2_29 = arith.constant 2 : index
    %c0_30 = arith.constant 0 : index
    %c0_31 = arith.constant 0 : index
    %44 = vector.load %arg7[%c2_29, %c0_30, %c0_31] : memref<9x1x16xf32, #tpu.memory_space<vmem>>, vector<1x1x16xf32>
    %45 = vector.shape_cast %44 : vector<1x1x16xf32> to vector<1x16xf32>
    %46 = vector.shape_cast %45 : vector<1x16xf32> to vector<1x1x16xf32>
    %47 = vector.broadcast %46 : vector<1x1x16xf32> to vector<4x16x16xf32>
    %48 = arith.mulf %43, %47 : vector<4x16x16xf32>
    %49 = arith.addf %42, %48 : vector<4x16x16xf32>
    %c1_32 = arith.constant 1 : index
    %c0_33 = arith.constant 0 : index
    %c0_34 = arith.constant 0 : index
    %50 = vector.load %arg12[%c1_32, %c0_33, %c0_34] : memref<6x24x16xf32, #tpu.memory_space<vmem>>, vector<4x16x16xf32>
    %c3 = arith.constant 3 : index
    %c0_35 = arith.constant 0 : index
    %c0_36 = arith.constant 0 : index
    %51 = vector.load %arg7[%c3, %c0_35, %c0_36] : memref<9x1x16xf32, #tpu.memory_space<vmem>>, vector<1x1x16xf32>
    %52 = vector.shape_cast %51 : vector<1x1x16xf32> to vector<1x16xf32>
    %53 = vector.shape_cast %52 : vector<1x16xf32> to vector<1x1x16xf32>
    %54 = vector.broadcast %53 : vector<1x1x16xf32> to vector<4x16x16xf32>
    %55 = arith.mulf %50, %54 : vector<4x16x16xf32>
    %56 = arith.addf %49, %55 : vector<4x16x16xf32>
    %c1_37 = arith.constant 1 : index
    %c1_38 = arith.constant 1 : index
    %c0_39 = arith.constant 0 : index
    %57 = vector.load %arg12[%c1_37, %c1_38, %c0_39] : memref<6x24x16xf32, #tpu.memory_space<vmem>>, vector<4x16x16xf32>
    %c4 = arith.constant 4 : index
    %c0_40 = arith.constant 0 : index
    %c0_41 = arith.constant 0 : index
    %58 = vector.load %arg7[%c4, %c0_40, %c0_41] : memref<9x1x16xf32, #tpu.memory_space<vmem>>, vector<1x1x16xf32>
    %59 = vector.shape_cast %58 : vector<1x1x16xf32> to vector<1x16xf32>
    %60 = vector.shape_cast %59 : vector<1x16xf32> to vector<1x1x16xf32>
    %61 = vector.broadcast %60 : vector<1x1x16xf32> to vector<4x16x16xf32>
    %62 = arith.mulf %57, %61 : vector<4x16x16xf32>
    %63 = arith.addf %56, %62 : vector<4x16x16xf32>
    %c1_42 = arith.constant 1 : index
    %c2_43 = arith.constant 2 : index
    %c0_44 = arith.constant 0 : index
    %64 = vector.load %arg12[%c1_42, %c2_43, %c0_44] : memref<6x24x16xf32, #tpu.memory_space<vmem>>, vector<4x16x16xf32>
    %c5 = arith.constant 5 : index
    %c0_45 = arith.constant 0 : index
    %c0_46 = arith.constant 0 : index
    %65 = vector.load %arg7[%c5, %c0_45, %c0_46] : memref<9x1x16xf32, #tpu.memory_space<vmem>>, vector<1x1x16xf32>
    %66 = vector.shape_cast %65 : vector<1x1x16xf32> to vector<1x16xf32>
    %67 = vector.shape_cast %66 : vector<1x16xf32> to vector<1x1x16xf32>
    %68 = vector.broadcast %67 : vector<1x1x16xf32> to vector<4x16x16xf32>
    %69 = arith.mulf %64, %68 : vector<4x16x16xf32>
    %70 = arith.addf %63, %69 : vector<4x16x16xf32>
    %c2_47 = arith.constant 2 : index
    %c0_48 = arith.constant 0 : index
    %c0_49 = arith.constant 0 : index
    %71 = vector.load %arg12[%c2_47, %c0_48, %c0_49] : memref<6x24x16xf32, #tpu.memory_space<vmem>>, vector<4x16x16xf32>
    %c6 = arith.constant 6 : index
    %c0_50 = arith.constant 0 : index
    %c0_51 = arith.constant 0 : index
    %72 = vector.load %arg7[%c6, %c0_50, %c0_51] : memref<9x1x16xf32, #tpu.memory_space<vmem>>, vector<1x1x16xf32>
    %73 = vector.shape_cast %72 : vector<1x1x16xf32> to vector<1x16xf32>
    %74 = vector.shape_cast %73 : vector<1x16xf32> to vector<1x1x16xf32>
    %75 = vector.broadcast %74 : vector<1x1x16xf32> to vector<4x16x16xf32>
    %76 = arith.mulf %71, %75 : vector<4x16x16xf32>
    %77 = arith.addf %70, %76 : vector<4x16x16xf32>
    %c2_52 = arith.constant 2 : index
    %c1_53 = arith.constant 1 : index
    %c0_54 = arith.constant 0 : index
    %78 = vector.load %arg12[%c2_52, %c1_53, %c0_54] : memref<6x24x16xf32, #tpu.memory_space<vmem>>, vector<4x16x16xf32>
    %c7 = arith.constant 7 : index
    %c0_55 = arith.constant 0 : index
    %c0_56 = arith.constant 0 : index
    %79 = vector.load %arg7[%c7, %c0_55, %c0_56] : memref<9x1x16xf32, #tpu.memory_space<vmem>>, vector<1x1x16xf32>
    %80 = vector.shape_cast %79 : vector<1x1x16xf32> to vector<1x16xf32>
    %81 = vector.shape_cast %80 : vector<1x16xf32> to vector<1x1x16xf32>
    %82 = vector.broadcast %81 : vector<1x1x16xf32> to vector<4x16x16xf32>
    %83 = arith.mulf %78, %82 : vector<4x16x16xf32>
    %84 = arith.addf %77, %83 : vector<4x16x16xf32>
    %c2_57 = arith.constant 2 : index
    %c2_58 = arith.constant 2 : index
    %c0_59 = arith.constant 0 : index
    %85 = vector.load %arg12[%c2_57, %c2_58, %c0_59] : memref<6x24x16xf32, #tpu.memory_space<vmem>>, vector<4x16x16xf32>
    %c8 = arith.constant 8 : index
    %c0_60 = arith.constant 0 : index
    %c0_61 = arith.constant 0 : index
    %86 = vector.load %arg7[%c8, %c0_60, %c0_61] : memref<9x1x16xf32, #tpu.memory_space<vmem>>, vector<1x1x16xf32>
    %87 = vector.shape_cast %86 : vector<1x1x16xf32> to vector<1x16xf32>
    %88 = vector.shape_cast %87 : vector<1x16xf32> to vector<1x1x16xf32>
    %89 = vector.broadcast %88 : vector<1x1x16xf32> to vector<4x16x16xf32>
    %90 = arith.mulf %85, %89 : vector<4x16x16xf32>
    %91 = arith.addf %84, %90 : vector<4x16x16xf32>
    %c0_62 = arith.constant 0 : index
    %c0_63 = arith.constant 0 : index
    %92 = vector.load %arg8[%c0_62, %c0_63] : memref<1x16xf32, #tpu.memory_space<vmem>>, vector<1x16xf32>
    %93 = vector.shape_cast %92 : vector<1x16xf32> to vector<1x1x16xf32>
    %94 = vector.broadcast %93 : vector<1x1x16xf32> to vector<4x16x16xf32>
    %95 = arith.mulf %91, %94 : vector<4x16x16xf32>
    %c0_64 = arith.constant 0 : index
    %c0_65 = arith.constant 0 : index
    %96 = vector.load %arg9[%c0_64, %c0_65] : memref<1x16xf32, #tpu.memory_space<vmem>>, vector<1x16xf32>
    %97 = vector.shape_cast %96 : vector<1x16xf32> to vector<1x1x16xf32>
    %98 = vector.broadcast %97 : vector<1x1x16xf32> to vector<4x16x16xf32>
    %99 = arith.addf %95, %98 : vector<4x16x16xf32>
    %c0_i32 = arith.constant 0 : i32
    %100 = arith.cmpi eq, %arg1, %c0_i32 : i32
    %101 = arith.extui %100 : i1 to i32
    %c0_i32_66 = arith.constant 0 : i32
    %102 = arith.cmpi ne, %101, %c0_i32_66 : i32
    scf.if %102 {
      %cst_78 = arith.constant 0.000000e+00 : f32
      %111 = vector.broadcast %cst_78 : f32 to vector<1x1x16xf32>
      %c0_79 = arith.constant 0 : index
      %c0_80 = arith.constant 0 : index
      %c0_81 = arith.constant 0 : index
      %112 = vector.load %arg11[%c0_79, %c0_80, %c0_81] : memref<1x1x16xf32, #tpu.memory_space<vmem>>, vector<1x1x16xf32>
      tpu.vector_store %arg11[%c0_79, %c0_80, %c0_81], %111 {strides = array<i32>} : memref<1x1x16xf32, #tpu.memory_space<vmem>>, vector<1x1x16xf32>,
    } else {
    }
    %c0_67 = arith.constant 0 : index
    %c0_68 = arith.constant 0 : index
    %c0_69 = arith.constant 0 : index
    %103 = vector.load %arg11[%c0_67, %c0_68, %c0_69] : memref<1x1x16xf32, #tpu.memory_space<vmem>>, vector<1x1x16xf32>
    %cst_70 = arith.constant dense<0.000000e+00> : vector<16xf32>
    %104 = vector.multi_reduction <add>, %99, %cst_70 [0, 1] : vector<4x16x16xf32> to vector<16xf32>
    %105 = vector.shape_cast %104 : vector<16xf32> to vector<1x1x16xf32>
    %106 = arith.addf %103, %105 : vector<1x1x16xf32>
    %c0_71 = arith.constant 0 : index
    %c0_72 = arith.constant 0 : index
    %c0_73 = arith.constant 0 : index
    %107 = vector.load %arg11[%c0_71, %c0_72, %c0_73] : memref<1x1x16xf32, #tpu.memory_space<vmem>>, vector<1x1x16xf32>
    tpu.vector_store %arg11[%c0_71, %c0_72, %c0_73], %106 {strides = array<i32>} : memref<1x1x16xf32, #tpu.memory_space<vmem>>, vector<1x1x16xf32>,
    %c0_74 = arith.constant 0 : index
    %c0_75 = arith.constant 0 : index
    %c0_76 = arith.constant 0 : index
    %c0_77 = arith.constant 0 : index
    %108 = vector.load %arg10[%c0_74, %c0_75, %c0_76, %c0_77] : memref<1x4x16x16xf32, #tpu.memory_space<vmem>>, vector<1x4x16x16xf32>
    %109 = vector.shape_cast %108 : vector<1x4x16x16xf32> to vector<4x16x16xf32>
    %110 = vector.shape_cast %99 : vector<4x16x16xf32> to vector<1x4x16x16xf32>
    tpu.vector_store %arg10[%c0_74, %c0_75, %c0_76, %c0_77], %110 {strides = array<i32>} : memref<1x4x16x16xf32, #tpu.memory_space<vmem>>, vector<1x4x16x16xf32>,
    return
  }
  func.func @transform_0(%arg0: i32, %arg1: i32) -> (i32, i32, i32, i32) {
    %c0_i32 = arith.constant 0 : i32
    %c0_i32_0 = arith.constant 0 : i32
    %c0_i32_1 = arith.constant 0 : i32
    %c0_i32_2 = arith.constant 0 : i32
    return %arg0, %c0_i32, %c0_i32_0, %c0_i32_1 : i32, i32, i32, i32
  }
  func.func @transform_1(%arg0: i32, %arg1: i32) -> (i32, i32) {
    %c0_i32 = arith.constant 0 : i32
    %c0_i32_0 = arith.constant 0 : i32
    %c0_i32_1 = arith.constant 0 : i32
    return %c0_i32, %c0_i32_0 : i32, i32
  }
  func.func @transform_2(%arg0: i32, %arg1: i32) -> (i32, i32) {
    %c0_i32 = arith.constant 0 : i32
    %c0_i32_0 = arith.constant 0 : i32
    %c0_i32_1 = arith.constant 0 : i32
    return %c0_i32, %c0_i32_0 : i32, i32
  }
  func.func @transform_3(%arg0: i32, %arg1: i32) -> (i32, i32) {
    %c0_i32 = arith.constant 0 : i32
    %c0_i32_0 = arith.constant 0 : i32
    %c0_i32_1 = arith.constant 0 : i32
    return %c0_i32, %c0_i32_0 : i32, i32
  }
  func.func @transform_4(%arg0: i32, %arg1: i32) -> (i32, i32) {
    %c0_i32 = arith.constant 0 : i32
    %c0_i32_0 = arith.constant 0 : i32
    %c0_i32_1 = arith.constant 0 : i32
    return %c0_i32, %c0_i32_0 : i32, i32
  }
  func.func @transform_5(%arg0: i32, %arg1: i32) -> (i32, i32, i32) {
    %c0_i32 = arith.constant 0 : i32
    %c0_i32_0 = arith.constant 0 : i32
    %c0_i32_1 = arith.constant 0 : i32
    %c0_i32_2 = arith.constant 0 : i32
    return %c0_i32, %c0_i32_0, %c0_i32_1 : i32, i32, i32
  }
  func.func @transform_6(%arg0: i32, %arg1: i32) -> (i32, i32) {
    %c0_i32 = arith.constant 0 : i32
    %c0_i32_0 = arith.constant 0 : i32
    %c0_i32_1 = arith.constant 0 : i32
    return %c0_i32, %c0_i32_0 : i32, i32
  }
  func.func @transform_7(%arg0: i32, %arg1: i32) -> (i32, i32) {
    %c0_i32 = arith.constant 0 : i32
    %c0_i32_0 = arith.constant 0 : i32
    %c0_i32_1 = arith.constant 0 : i32
    return %c0_i32, %c0_i32_0 : i32, i32
  }
  func.func @transform_8(%arg0: i32, %arg1: i32) -> (i32, i32, i32, i32) {
    %c0_i32 = arith.constant 0 : i32
    %c0_i32_0 = arith.constant 0 : i32
    %c0_i32_1 = arith.constant 0 : i32
    return %arg0, %arg1, %c0_i32, %c0_i32_0 : i32, i32, i32, i32
  }
  func.func @transform_9(%arg0: i32, %arg1: i32) -> (i32, i32, i32) {
    %c0_i32 = arith.constant 0 : i32
    %c0_i32_0 = arith.constant 0 : i32
    %c0_i32_1 = arith.constant 0 : i32
    return %arg0, %c0_i32, %c0_i32_0 : i32, i32, i32
  }
}

</mosaic_0001>

<bundles_post_ra>
// kernel: tpu_custom_call.1
= control target key start
LH: loop header
LB: loop body
LE: loop exit
PB: predicated region body
PF: predicated region fallthrough
CT: control target
= control target key end

     0   :  { %s2233_s0 = inlined_call_operand.vmem [shape: f32[2,18,24,8], index: 0, kind: input, shape index: {}]   ;;  %s2234_s1 = inlined_call_operand.vmem [shape: f32[8,16], index: 1, kind: input, shape index: {}]   ;;  %s2235_s2 = inlined_call_operand.vmem [shape: f32[1,16], index: 2, kind: input, shape index: {}]   ;;  %s2236_s3 = inlined_call_operand.vmem [shape: f32[1,16], index: 3, kind: input, shape index: {}]   ;;  %s2237_s4 = inlined_call_operand.vmem [shape: f32[432,1], index: 4, kind: input, shape index: {}]   ;;  %s2238_s5 = inlined_call_operand.vmem [shape: f32[9,1,16], index: 5, kind: input, shape index: {}]   ;;  %s2239_s6 = inlined_call_operand.vmem [shape: f32[1,16], index: 6, kind: input, shape index: {}]   ;;  %s2240_s7 = inlined_call_operand.vmem [shape: f32[1,16], index: 7, kind: input, shape index: {}]   ;;  %s2241_s8 = inlined_call_operand.hbm [shape: f32[2,16,16,16], index: 8, kind: output, shape index: {0}]   ;;  %s2242_s9 = inlined_call_operand.hbm [shape: f32[2,1,16], index: 9, kind: output, shape index: {1}]  }
   0x1   :  { %2252 = sst [smem:[#allocation20_spill]] %s2233_s0 }
   0x2   :  { %2253 = sst [smem:[#allocation21_spill]] %s2234_s1 }
   0x3   :  { %2254 = sst [smem:[#allocation22_spill]] %s2235_s2 }
   0x4   :  { %2255 = sst [smem:[#allocation23_spill]] %s2236_s3 }
   0x5   :  { %2256 = sst [smem:[#allocation24_spill]] %s2242_s9 }
   0x6   :  { %15 = vsyncpa [#allocation4], 0 }
   0x7   :  { %17 = vsyncpa [#allocation4 + $0x1], 0 }
   0x8   :  { %18 = vsyncpa [#allocation6], 0 }
   0x9   :  { %20 = vsyncpa [#allocation6 + $0x1], 0  ;;  %s1619_s30 = smov 0   ;;  %s1621_s10 = smov 0  }
   0xa   :  { %s1623_s11 = smov 0   ;;  %s1625_s12 = smov 0  }
   0xb   :  { %s1627_s13 = smov 0   ;;  %s1629_s14 = smov 0  }
   0xc   :  { %s1631_s15 = smov 0   ;;  %s1633_s16 = smov 0  }
   0xd   :  { %s1635_s17 = smov 0   ;;  %s1637_s18 = smov 0  }
   0xe   :  { %s1639_s19 = smov 0  }
   0xf LB: > { %2257 = sst [smem:[#allocation9_spill]] %s1535_s12  ;;  %s1245_s20 = sadd.s32 4294967295, %s1563_s19   ;;  %s1563_s19 = sphi %s1639_s19, %s26_s19   ;;  %s1559_s18 = sphi %s1637_s18, %s2292_s18   ;;  %s1555_s17 = sphi %s1635_s17, %s2291_s17   ;;  %s1551_s16 = sphi %s1633_s16, %s2290_s16   ;;  %s1547_s15 = sphi %s1631_s15, %s2289_s15   ;;  %s1543_s14 = sphi %s1629_s14, %s2298_s14   ;;  %s1539_s13 = sphi %s1627_s13, %s2297_s13   ;;  %s1535_s12 = sphi %s1625_s12, %s2296_s12   ;;  %s1531_s11 = sphi %s1623_s11, %s2295_s11   ;;  %s1527_s10 = sphi %s1621_s10, %s2294_s10   ;;  %s1523_s30 = sphi %s1619_s30, %s2293_s30  }
  0x10   : > { %2258 = sst [smem:[#allocation10_spill]] %s1555_s17  ;;  %s1246_s21 = sadd.s32 4294967294, %s1563_s19  }
  0x11   : > { %2259 = sst [smem:[#allocation11_spill]] %s1559_s18  ;;  %s35_s22 = sadd.s32 1, %s1555_s17 }
  0x12   : > { %s38_s23 = sadd.s32 1, %s1559_s18  ;;  %p36_p0 = scmp.ge.s32.totalorder %s35_s22, 4 }
  0x13   : > { %s220_s24 = sadd.s32 1, %s1543_s14  ;;  %p230_p1 = scmp.ne.s32.totalorder %s1543_s14, %s1539_s13 }
  0x14   : > { %p1681_p2 = scmp.eq.s32.totalorder %s1245_s20, 7  ;;  %s2300_s22 = smov (%p36_p0, %s35_s22), 0 }
  0x15   : > { %2261 = sst [smem:[#allocation12_spill]] %s2300_s22  ;;  %s2302_s23 = smov (!%p36_p0, %s38_s23), %s1559_s18 }
  0x16   : > { %s216_s26 = ssub.s32 %s1555_s17, %s2300_s22  ;;  %p1692_p3 = por %p1681_p2, %p230_p1 }
  0x17   : > { %p40_p4 = scmp.ge.s32.totalorder %s2302_s23, 2  ;;  %p236_p5 = scmp.ne.s32.totalorder %s1539_s13, %s1535_s12 }
  0x18   : > { %s2262_s27 = scalar_select %p1692_p3, 1, 0 }
  0x19   : > { %p1698_p6 = scmp.eq.s32.totalorder %s1246_s21, 7  ;;  %s246_s29 = sadd.s32 1, %s1531_s11 }
  0x1a   : > { %2263 = sst [smem:[#allocation13_spill]] %s2262_s27  ;;  %s2304_s23 = smov (%p40_p4, %s2302_s23), 0 }
  0x1b   : > { %2265 = sst [smem:[#allocation14_spill]] %s2304_s23  ;;  %p1707_p7 = por %p1698_p6, %p236_p5 }
  0x1c   : > { %p256_p8 = scmp.ne.s32.totalorder %s1531_s11, %s1527_s10  ;;  %s215_s22 = ssub.s32 %s1559_s18, %s2304_s23 }
  0x1d   : > { %p262_p9 = scmp.ne.s32.totalorder %s1527_s10, %s1523_s30  ;;  %s217_s17 = sor.u32 %s216_s26, %s215_s22 }
  0x1e   : > { %p244_p10 = scmp.eq.s32.totalorder %s215_s22, 0  ;;  %p218_p11 = scmp.eq.s32.totalorder %s217_s17, 0 }
  0x1f   : > { %p1719_p12 = por %p256_p8, %p1681_p2  ;;  %p1731_p13 = por %p262_p9, %p1698_p6 }
  0x20   : > { %s1724_s12 = scalar_select %p244_p10, %s1531_s11, %s246_s29  }
  0x21   : > { %s1727_s9 = scalar_select %p218_p11, %s1543_s14, %s220_s24  }
  0x22   : > { %p1249_p0 = scmp.ge.s32.totalorder %s1563_s19, 1  ;;  %p310_p1 = scmp.lt.s32.totalorder %s1563_s19, 9 }
  0x24   : > { %p311_p4 = pnand %p1249_p0, %p310_p1 }
  0x26   : > { %314 = sbr.rel (%p311_p4) target bundleno = 307 (0x133), region = 52 }
  0x2b   : > { %s1253_s17 = smul.u32 96, %s1547_s15  ;;  %s2251_s22 = sand.u32 1, %s1539_s13   ;;  %v1565_v1 = vmov 0   ;;  %vm378_vm0 = vcmask 64512   ;;  %vm765_vm1 = vcmask 130048  }
  0x2c   : > { %s2269_s1 = sld [smem:[#allocation21_spill]]  ;;  %1398 = vset.pattern.permute.xlu1 %v1565_v1  ;;  %1397 = vset.pattern.permute.xlu0 %v1565_v1  ;;  %s1744_s24 = sshll.u32 %s2251_s22, 6 }
  0x2d   : > { %s1750_s18 = scalar_lea.vmem %s2237_s4, %s1253_s17  ;;  %p350_p2 = scmp.lt.s32.totalorder %s1551_s16, 1  ;;  %1399 = vset.pattern.permute.xlu2 %v1565_v1 }
  0x2e   : > { %v641_v2 = vld [vmem:[%s1750_s18 + $0x10] sm:$0xff]  ;;  %v639_v3 = vld [vmem:[%s1750_s18] sm:$0xff]  ;;  %s2270_s0 = sld [smem:[#allocation20_spill]]  ;;  %v642_v5 = vld [vmem:[%s1750_s18 + $0x18] sm:$0xff]  ;;  %p1280_p5 = scmp.ne.s32.totalorder %s1547_s15, 0 }
  0x2f   : > { %669 = vperm.xlu1 %1398, %v641_v2   ;;  %659 = vperm.xlu0 %1397, %v639_v3   ;;  %s351_s25 = scalar_select %p350_p2, %s1551_s16, 1  ;;  %v643_v4 = vld [vmem:[%s1750_s18 + $0x20] sm:$0xff]  ;;  %v640_v6 = vld [vmem:[%s1750_s18 + $0x8] sm:$0xff]  ;;  %v646_v16 = vld [vmem:[%s1750_s18 + $0x38] sm:$0xff] }
  0x30   : > { %679 = vperm.xlu2 %1399, %v643_v4   ;;  %v644_v11 = vld [vmem:[%s1750_s18 + $0x28] sm:$0xff]  ;;  %v645_v17 = vld [vmem:[%s1750_s18 + $0x30] sm:$0xff]  ;;  %v647_v18 = vld [vmem:[%s1750_s18 + $0x40] sm:$0xff]  ;;  %s2271_s2 = sld [smem:[#allocation22_spill]] }
  0x31   : > { %s1292_s23 = smul.u32 432, %s351_s25  ;;  %v649_v23 = vld [vmem:[%s1750_s18 + $0x50] sm:$0xff]  ;;  %v648_v24 = vld [vmem:[%s1750_s18 + $0x48] sm:$0xff]  ;;  %v650_v25 = vld [vmem:[%s1750_s18 + $0x58] sm:$0xff]  ;;  %s2272_s3 = sld [smem:[#allocation23_spill]] }
  0x32   : > { %v377_v0 = vld [vmem:[%s2269_s1] sm:$0xff]  ;;  %v652_v29 = vld [vmem:[%s1750_s18 + $0x68] sm:$0xff]  ;;  %v653_v31 = vld [vmem:[%s1750_s18 + $0x70] sm:$0xff] }
  0x33   : > { %448 = vmatpush.msra.mxu0 %v377_v0  ;;  %1289 = vmatpush.msra.mxu1 %v377_v0  ;;  %v651_v30 = vld [vmem:[%s1750_s18 + $0x60] sm:$0xff]  ;;  %v654_v36 = vld [vmem:[%s1750_s18 + $0x78] sm:$0xff]  ;;  %v656_v37 = vld [vmem:[%s1750_s18 + $0x88] sm:$0xff] }
  0x34   : > { %1290 = vmatpush.msra.mxu2 %v377_v0  ;;  %1291 = vmatpush.msra.mxu3 %v377_v0  ;;  %s354_s22 = scalar_lea.vmem %s2270_s0, %s1292_s23  ;;  %v655_v35 = vld [vmem:[%s1750_s18 + $0x80] sm:$0xff]  ;;  %s2121_s18 = scalar_lea.vmem [#allocation3], %s1744_s24 }
  0x35   : > { %s1760_s28 = scalar_lea.vmem %s354_s22, %s1253_s17 }
  0x36   : > { %v359_v7 = vld [vmem:[%s1760_s28] sm:$0xff]  ;;  %v364_v8 = vld [vmem:[%s1760_s28 + $0x28] sm:$0xff]  ;;  %v369_v9 = vld [vmem:[%s1760_s28 + $0x50] sm:$0xff] }
  0x37   : > { %1254 = vmatmul.msk.f32.vlgmr.msra.gmra.mxu0 %vm378_vm0, %v359_v7  ;;  %1259 = vmatmul.msk.f32.vlgmr.msra.gmra.mxu1 %vm378_vm0, %v364_v8  ;;  %v374_v10 = vld [vmem:[%s1760_s28 + $0x78] sm:$0xff]  ;;  %v360_v12 = vld [vmem:[%s1760_s28 + $0x8] sm:$0xff]  ;;  %v365_v13 = vld [vmem:[%s1760_s28 + $0x30] sm:$0xff] }
  0x38   : > { %1264 = vmatmul.msk.f32.vlgmr.msra.gmra.mxu2 %vm378_vm0, %v369_v9  ;;  %1269 = vmatmul.msk.f32.vlgmr.msra.gmra.mxu3 %vm378_vm0, %v374_v10  ;;  %v370_v14 = vld [vmem:[%s1760_s28 + $0x58] sm:$0xff]  ;;  %v375_v15 = vld [vmem:[%s1760_s28 + $0x80] sm:$0xff]  ;;  %v361_v19 = vld [vmem:[%s1760_s28 + $0x10] sm:$0xff] }
  0x39   : > { %674 = vperm.xlu1 %1398, %v642_v5   ;;  %664 = vperm.xlu0 %1397, %v640_v6   ;;  %v366_v20 = vld [vmem:[%s1760_s28 + $0x38] sm:$0xff]  ;;  %v371_v21 = vld [vmem:[%s1760_s28 + $0x60] sm:$0xff]  ;;  %v376_v22 = vld [vmem:[%s1760_s28 + $0x88] sm:$0xff] }
  0x3a   : > { %684 = vperm.xlu2 %1399, %v644_v11   ;;  %v362_v26 = vld [vmem:[%s1760_s28 + $0x18] sm:$0xff]  ;;  %v367_v27 = vld [vmem:[%s1760_s28 + $0x40] sm:$0xff]  ;;  %v372_v28 = vld [vmem:[%s1760_s28 + $0x68] sm:$0xff] }
  0x3b   : > { %v363_v32 = vld [vmem:[%s1760_s28 + $0x20] sm:$0xff]  ;;  %v368_v33 = vld [vmem:[%s1760_s28 + $0x48] sm:$0xff]  ;;  %v373_v34 = vld [vmem:[%s1760_s28 + $0x70] sm:$0xff]  ;;  %s2283_s28 = sand.u32 1, %s1527_s10  }
  0x3c   : > { %v1824_v43 = vld [vmem:[%s2271_s2] ss:$0 sm:$0xff]  ;;  %s2125_s25 = scalar_lea.vmem [#allocation5], %s2283_s28 }
  0x3d   : > { %v1831_v46 = vld [vmem:[%s2272_s3] ss:$0 sm:$0xff] }
  0x3f   : > { %1255 = vmatmul.msk.f32.gmra.mxu0 %vm378_vm0, %v360_v12  ;;  %1260 = vmatmul.msk.f32.gmra.mxu1 %vm378_vm0, %v365_v13 }
  0x40   : > { %1265 = vmatmul.msk.f32.gmra.mxu2 %vm378_vm0, %v370_v14  ;;  %1270 = vmatmul.msk.f32.gmra.mxu3 %vm378_vm0, %v375_v15 }
  0x41   : > { %694 = vperm.xlu1 %1398, %v646_v16   ;;  %689 = vperm.xlu0 %1397, %v645_v17  }
  0x42   : > { %699 = vperm.xlu2 %1399, %v647_v18  }
  0x47   : > { %1256 = vmatmul.msk.f32.gmra.mxu0 %vm378_vm0, %v361_v19  ;;  %1261 = vmatmul.msk.f32.gmra.mxu1 %vm378_vm0, %v366_v20 }
  0x48   : > { %1266 = vmatmul.msk.f32.gmra.mxu2 %vm378_vm0, %v371_v21  ;;  %1271 = vmatmul.msk.f32.gmra.mxu3 %vm378_vm0, %v376_v22 }
  0x49   : > { %709 = vperm.xlu1 %1398, %v649_v23   ;;  %704 = vperm.xlu0 %1397, %v648_v24  }
  0x4a   : > { %714 = vperm.xlu2 %1399, %v650_v25  }
  0x4f   : > { %1257 = vmatmul.msk.f32.gmra.mxu0 %vm378_vm0, %v362_v26  ;;  %1262 = vmatmul.msk.f32.gmra.mxu1 %vm378_vm0, %v367_v27 }
  0x50   : > { %1267 = vmatmul.msk.f32.gmra.mxu2 %vm378_vm0, %v372_v28 }
  0x51   : > { %724 = vperm.xlu1 %1398, %v652_v29   ;;  %719 = vperm.xlu0 %1397, %v651_v30  }
  0x52   : > { %729 = vperm.xlu2 %1399, %v653_v31  }
  0x57   : > { %1258 = vmatmul.msk.f32.gmra.mxu0 %vm378_vm0, %v363_v32  ;;  %1263 = vmatmul.msk.f32.gmra.mxu1 %vm378_vm0, %v368_v33 }
  0x58   : > { %1268 = vmatmul.msk.f32.gmra.mxu2 %vm378_vm0, %v373_v34 }
  0x59   : > { %739 = vperm.xlu1 %1398, %v655_v35   ;;  %734 = vperm.xlu0 %1397, %v654_v36  }
  0x5a   : > { %744 = vperm.xlu2 %1399, %v656_v37  }
  0x8a   : > { %v1815_v40 = vpop.permute.xlu2 %679 }
  0x94   : > { %v685_v44 = vpop.permute.xlu2 %684 }
  0x9c   : > { %v1839_v60 = vpop.permute.xlu2 %699 }
  0xa1   : > { %v660_v38 = vpop.permute.xlu0 %659  ;;  %v1813_v39 = vpop.permute.xlu1 %669 }
  0xa4   : > { %v715_v34 = vpop.permute.xlu2 %714 }
  0xab   : > { %v1817_v41 = vpop.permute.xlu0 %664  ;;  %v1819_v42 = vpop.permute.xlu1 %674 }
  0xb3   : > { %v1826_v45 = vpop.permute.xlu0 %689  ;;  %v1835_v51 = vpop.permute.xlu1 %694 }
  0xb4   : > { %v450_v47 = vpop.f32.mrf.mxu0  ;;  %v465_v48 = vpop.f32.mrf.mxu1 }
  0xb5   : > { %v508_v49 = vmul.f32 %v1824_v43, %v450_v47  ;;  %v513_v50 = vmul.f32 %v1824_v43, %v465_v48 }
  0xb7   : > { %v530_v52 = vadd.f32 %v1831_v46, %v508_v49  ;;  %v535_v53 = vadd.f32 %v1831_v46, %v513_v50 }
  0xb9   : > { %v548_v54 = vadd.f32 3.0, %v530_v52  ;;  %v553_v55 = vadd.f32 3.0, %v535_v53 }
  0xbb   : > { %v566_v56 = vmax.f32 %v548_v54, 0.0  ;;  %v571_v57 = vmax.f32 %v553_v55, 0.0  ;;  %v480_v58 = vpop.f32.mrf.mxu2  ;;  %v495_v59 = vpop.f32.mrf.mxu3 }
  0xbc   : > { %v518_v61 = vmul.f32 %v1824_v43, %v480_v58  ;;  %v523_v62 = vmul.f32 %v1824_v43, %v495_v59  ;;  %v1843_v63 = vpop.permute.xlu0 %704  ;;  %v453_v2 = vpop.f32.mrf.mxu0 }
  0xbd   : > { %v584_v0 = vmin.f32 %v566_v56, 6.0  ;;  %v589_v1 = vmin.f32 %v571_v57, 6.0  ;;  %v468_v3 = vpop.f32.mrf.mxu1  ;;  %v509_v6 = vmul.f32 %v1824_v43, %v453_v2  ;;  %v710_v12 = vpop.permute.xlu1 %709 }
  0xbe   : > { %v540_v4 = vadd.f32 %v1831_v46, %v518_v61  ;;  %v545_v5 = vadd.f32 %v1831_v46, %v523_v62  ;;  %v514_v7 = vmul.f32 %v1824_v43, %v468_v3 }
  0xbf   : > { %v602_v8 = vmul.f32 %v584_v0, %v530_v52  ;;  %v607_v9 = vmul.f32 %v589_v1, %v535_v53  ;;  %v531_v13 = vadd.f32 %v1831_v46, %v509_v6 }
  0xc0   : > { %v558_v10 = vadd.f32 3.0, %v540_v4  ;;  %v563_v11 = vadd.f32 3.0, %v545_v5  ;;  %v536_v14 = vadd.f32 %v1831_v46, %v514_v7 }
  0xc1   : > { %v620_v15 = vmul.f32 0.16666667, %v602_v8  ;;  %v625_v16 = vmul.f32 0.16666667, %v607_v9  ;;  %v549_v19 = vadd.f32 3.0, %v531_v13 }
  0xc2   : > { %v576_v17 = vmax.f32 %v558_v10, 0.0  ;;  %v581_v18 = vmax.f32 %v563_v11, 0.0  ;;  %v554_v20 = vadd.f32 3.0, %v536_v14 }
  0xc3   : > { %v747_v21 = vmul.f32 %v660_v38, %v620_v15  ;;  %v752_v22 = vmul.f32 %v685_v44, %v625_v16  ;;  %v483_v23 = vpop.f32.mrf.mxu2  ;;  %v498_v24 = vpop.f32.mrf.mxu3  ;;  %v567_v26 = vmax.f32 %v549_v19, 0.0 }
  0xc4   : > { %v594_v25 = vmin.f32 %v576_v17, 6.0  ;;  %v572_v27 = vmax.f32 %v554_v20, 0.0  ;;  %v519_v28 = vmul.f32 %v1824_v43, %v483_v23  ;;  %v1852_v29 = vpop.permute.xlu0 %719  ;;  %v524_v30 = vmul.f32 %v1824_v43, %v498_v24  ;;  %v456_v31 = vpop.f32.mrf.mxu0 }
  0xc5   : > { %766 = vst.msk [vmem:[#allocation2] sm:$0xff] %vm765_vm1, %v747_v21  ;;  %v471_v32 = vpop.f32.mrf.mxu1  ;;  %v599_v33 = vmin.f32 %v581_v18, 6.0  ;;  %v585_v36 = vmin.f32 %v567_v26, 6.0  ;;  %v510_v47 = vmul.f32 %v1824_v43, %v456_v31  ;;  %v1863_v1 = vpop.permute.xlu1 %724 }
  0xc6   : > { %771 = vst.msk [vmem:[#allocation2 + $0x28] sm:$0xff] %vm765_vm1, %v752_v22  ;;  %v612_v35 = vmul.f32 %v594_v25, %v540_v4  ;;  %v590_v37 = vmin.f32 %v572_v27, 6.0  ;;  %v541_v38 = vadd.f32 %v1831_v46, %v519_v28  ;;  %v546_v44 = vadd.f32 %v1831_v46, %v524_v30  ;;  %v1875_v23 = vpop.permute.xlu2 %729 }
  0xc7   : > { %v515_v48 = vmul.f32 %v1824_v43, %v471_v32  ;;  %v617_v49 = vmul.f32 %v599_v33, %v545_v5  ;;  %v603_v52 = vmul.f32 %v585_v36, %v531_v13  ;;  %v532_v56 = vadd.f32 %v1831_v46, %v510_v47 }
  0xc8   : > { %v630_v50 = vmul.f32 0.16666667, %v612_v35  ;;  %v608_v53 = vmul.f32 %v590_v37, %v536_v14  ;;  %v559_v54 = vadd.f32 3.0, %v541_v38  ;;  %v564_v55 = vadd.f32 3.0, %v546_v44 }
  0xc9   : > { %v537_v57 = vadd.f32 %v1831_v46, %v515_v48  ;;  %v635_v58 = vmul.f32 0.16666667, %v617_v49  ;;  %v621_v61 = vmul.f32 0.16666667, %v603_v52  ;;  %v550_v3 = vadd.f32 3.0, %v532_v56 }
  0xca   : > { %v757_v59 = vmul.f32 %v710_v12, %v630_v50  ;;  %v626_v62 = vmul.f32 0.16666667, %v608_v53  ;;  %v577_v0 = vmax.f32 %v559_v54, 0.0  ;;  %v582_v2 = vmax.f32 %v564_v55, 0.0 }
  0xcb   : > { %v555_v4 = vadd.f32 3.0, %v537_v57  ;;  %v486_v5 = vpop.f32.mrf.mxu2  ;;  %v501_v6 = vpop.f32.mrf.mxu3  ;;  %v748_v7 = vmul.f32 %v1817_v41, %v621_v61  ;;  %v568_v12 = vmax.f32 %v550_v3, 0.0 }
  0xcc   : > { %776 = vst.msk [vmem:[#allocation2 + $0x50] sm:$0xff] %vm765_vm1, %v757_v59  ;;  %v753_v8 = vmul.f32 %v1826_v45, %v626_v62  ;;  %v595_v9 = vmin.f32 %v577_v0, 6.0  ;;  %v520_v10 = vmul.f32 %v1824_v43, %v486_v5  ;;  %v735_v11 = vpop.permute.xlu0 %734  ;;  %v525_v14 = vmul.f32 %v1824_v43, %v501_v6  ;;  %v459_v15 = vpop.f32.mrf.mxu0 }
  0xcd   : > { %v573_v13 = vmax.f32 %v555_v4, 0.0  ;;  %v474_v16 = vpop.f32.mrf.mxu1  ;;  %767 = vst.msk [vmem:[#allocation2 + $0x8] sm:$0xff] %vm765_vm1, %v748_v7  ;;  %v600_v19 = vmin.f32 %v582_v2, 6.0  ;;  %v762_v20 = vmul.f32 %v735_v11, %v635_v58  ;;  %v586_v41 = vmin.f32 %v568_v12, 6.0  ;;  %v740_v48 = vpop.permute.xlu1 %739  ;;  %v1894_v7 = vld [vmem:[%s2238_s5 + $0x1] ss:$0 sm:$0xff] }
  0xce   : > { %v613_v17 = vmul.f32 %v595_v9, %v541_v38  ;;  %v542_v18 = vadd.f32 %v1831_v46, %v520_v10  ;;  %772 = vst.msk [vmem:[#allocation2 + $0x30] sm:$0xff] %vm765_vm1, %v753_v8  ;;  %v547_v21 = vadd.f32 %v1831_v46, %v525_v14  ;;  %v511_v22 = vmul.f32 %v1824_v43, %v459_v15  ;;  %v745_v0 = vpop.permute.xlu2 %744  ;;  %v1908_v14 = vld [vmem:[%s2238_s5 + $0x3] ss:$0 sm:$0xff]  ;;  %v1913_v15 = vld [vmem:[%s2238_s5 + $0x6] ss:$0 sm:$0xff] }
  0xcf   : > { %v591_v45 = vmin.f32 %v573_v13, 6.0  ;;  %v618_v26 = vmul.f32 %v600_v19, %v546_v44  ;;  %781 = vst.msk [vmem:[#allocation2 + $0x78] sm:$0xff] %vm765_vm1, %v762_v20  ;;  %v516_v27 = vmul.f32 %v1824_v43, %v474_v16  ;;  %v604_v28 = vmul.f32 %v586_v41, %v532_v56  ;;  %v1903_v13 = vld [vmem:[%s2238_s5] ss:$0 sm:$0xff] }
  0xd0   : > { %v631_v24 = vmul.f32 0.16666667, %v613_v17  ;;  %v560_v25 = vadd.f32 3.0, %v542_v18  ;;  %v565_v31 = vadd.f32 3.0, %v547_v21  ;;  %v533_v49 = vadd.f32 %v1831_v46, %v511_v22  ;;  %v784_v16 = vld [vmem:[#allocation2] sm:$0xff] }
  0xd1   : > { %v609_v30 = vmul.f32 %v591_v45, %v537_v57  ;;  %v636_v35 = vmul.f32 0.16666667, %v618_v26  ;;  %v622_v36 = vmul.f32 0.16666667, %v604_v28  ;;  %v538_v44 = vadd.f32 %v1831_v46, %v516_v27 }
  0xd2   : > { %v758_v32 = vmul.f32 %v715_v34, %v631_v24  ;;  %v578_v33 = vmax.f32 %v560_v25, 0.0  ;;  %v583_v38 = vmax.f32 %v565_v31, 0.0  ;;  %v551_v59 = vadd.f32 3.0, %v533_v49 }
  0xd3   : > { %v627_v37 = vmul.f32 0.16666667, %v609_v30  ;;  %v749_v50 = vmul.f32 %v1813_v39, %v622_v36  ;;  %v763_v54 = vmul.f32 %v740_v48, %v636_v35  ;;  %v489_v55 = vpop.f32.mrf.mxu2  ;;  %v556_v62 = vadd.f32 3.0, %v538_v44  ;;  %v791_v17 = vld [vmem:[#allocation2 + $0x50] sm:$0xff] }
  0xd4   : > { %777 = vst.msk [vmem:[#allocation2 + $0x58] sm:$0xff] %vm765_vm1, %v758_v32  ;;  %v596_v47 = vmin.f32 %v578_v33, 6.0  ;;  %v601_v53 = vmin.f32 %v583_v38, 6.0  ;;  %v462_v57 = vpop.f32.mrf.mxu0  ;;  %v521_v39 = vmul.f32 %v1824_v43, %v489_v55  ;;  %v569_v2 = vmax.f32 %v551_v59, 0.0  ;;  %v785_v20 = vld [vmem:[#allocation2 + $0x8] sm:$0xff] }
  0xd5   : > { %v754_v52 = vmul.f32 %v1835_v51, %v627_v37  ;;  %768 = vst.msk [vmem:[#allocation2 + $0x10] sm:$0xff] %vm765_vm1, %v749_v50  ;;  %v512_v3 = vmul.f32 %v1824_v43, %v462_v57  ;;  %v574_v5 = vmax.f32 %v556_v62, 0.0  ;;  %v477_v6 = vpop.f32.mrf.mxu1  ;;  %v833_v45 = vld [vmem:[#allocation2 + $0x2] sm:$0xff]  ;;  %v788_v24 = vld [vmem:[#allocation2 + $0x30] sm:$0xff]  ;;  %v796_v27 = vmul.f32 %v1903_v13, %v784_v16 }
  0xd6   : > { %v614_v34 = vmul.f32 %v596_v47, %v542_v18  ;;  %v619_v56 = vmul.f32 %v601_v53, %v547_v21  ;;  %782 = vst.msk [vmem:[#allocation2 + $0x80] sm:$0xff] %vm765_vm1, %v763_v54  ;;  %v587_v8 = vmin.f32 %v569_v2, 6.0  ;;  %v543_v10 = vadd.f32 %v1831_v46, %v521_v39  ;;  %v1918_v18 = vld [vmem:[%s2238_s5 + $0x2] ss:$0 sm:$0xff]  ;;  %v957_v50 = vld [vmem:[#allocation2 + $0x78] sm:$0xff] }
  0xd7   : > { %773 = vst.msk [vmem:[#allocation2 + $0x38] sm:$0xff] %vm765_vm1, %v754_v52  ;;  %v592_v9 = vmin.f32 %v574_v5, 6.0  ;;  %v534_v11 = vadd.f32 %v1831_v46, %v512_v3  ;;  %v517_v12 = vmul.f32 %v1824_v43, %v477_v6  ;;  %v803_v28 = vmul.f32 %v1903_v13, %v791_v17  ;;  %v1942_v57 = vld [vmem:[%s2238_s5 + $0x4] ss:$0 sm:$0xff]  ;;  %v1961_v3 = vld [vmem:[%s2238_s5 + $0x7] ss:$0 sm:$0xff] }
  0xd8   : > { %v632_v58 = vmul.f32 0.16666667, %v614_v34  ;;  %v637_v61 = vmul.f32 0.16666667, %v619_v56  ;;  %v605_v19 = vmul.f32 %v587_v8, %v533_v49  ;;  %v561_v22 = vadd.f32 3.0, %v543_v10 }
  0xd9   : > { %v610_v21 = vmul.f32 %v592_v9, %v538_v44  ;;  %v552_v25 = vadd.f32 3.0, %v534_v11  ;;  %v539_v26 = vadd.f32 %v1831_v46, %v517_v12  ;;  %v1925_v30 = vmul.f32 %v1908_v14, %v791_v17 }
  0xda   : > { %v759_v51 = vmul.f32 %v1852_v29, %v632_v58  ;;  %v764_v4 = vmul.f32 %v745_v0, %v637_v61  ;;  %v804_v29 = vld [vmem:[#allocation2 + $0x1] sm:$0xff]  ;;  %v1928_v32 = vmul.f32 %v1913_v15, %v791_v17  ;;  %v797_v33 = vmul.f32 %v1903_v13, %v785_v20 }
  0xdb   : > { %v817_v41 = vmul.f32 %v1894_v7, %v804_v29  ;;  %v492_v31 = vpop.f32.mrf.mxu2  ;;  %v846_v35 = vmul.f32 %v1918_v18, %v833_v45  ;;  %v811_v36 = vld [vmem:[#allocation2 + $0x51] sm:$0xff]  ;;  %v623_v37 = vmul.f32 0.16666667, %v605_v19  ;;  %v800_v47 = vmul.f32 %v1903_v13, %v788_v24  ;;  %v1947_v58 = vld [vmem:[%s2238_s5 + $0x5] ss:$0 sm:$0xff] }
  0xdc   : > { %778 = vst.msk [vmem:[#allocation2 + $0x60] sm:$0xff] %vm765_vm1, %v759_v51  ;;  %v628_v48 = vmul.f32 0.16666667, %v610_v21  ;;  %v579_v49 = vmax.f32 %v561_v22, 0.0  ;;  %v840_v44 = vld [vmem:[#allocation2 + $0x52] sm:$0xff]  ;;  %v570_v53 = vmax.f32 %v552_v25, 0.0  ;;  %v522_v34 = vmul.f32 %v1824_v43, %v492_v31 }
  0xdd   : > { %783 = vst.msk [vmem:[#allocation2 + $0x88] sm:$0xff] %vm765_vm1, %v764_v4  ;;  %v825_v38 = vadd.f32 %v817_v41, %v796_v27  ;;  %v750_v52 = vmul.f32 %v1819_v42, %v623_v37  ;;  %v557_v54 = vadd.f32 3.0, %v539_v26  ;;  %v1936_v55 = vmul.f32 %v1908_v14, %v788_v24  ;;  %v805_v42 = vld [vmem:[#allocation2 + $0x9] sm:$0xff] }
  0xde   : > { %v824_v56 = vmul.f32 %v1894_v7, %v811_v36  ;;  %v755_v59 = vmul.f32 %v1839_v60, %v628_v48  ;;  %v597_v61 = vmin.f32 %v579_v49, 6.0  ;;  %v1951_v43 = vmul.f32 %v1913_v15, %v788_v24  ;;  %v1966_v60 = vld [vmem:[%s2238_s5 + $0x8] ss:$0 sm:$0xff]  ;;  %v808_v4 = vld [vmem:[#allocation2 + $0x31] sm:$0xff] }
  0xdf   : > { %769 = vst.msk [vmem:[#allocation2 + $0x18] sm:$0xff] %vm765_vm1, %v750_v52  ;;  %v588_v62 = vmin.f32 %v570_v53, 6.0  ;;  %v575_v39 = vmax.f32 %v557_v54, 0.0  ;;  %v544_v0 = vadd.f32 %v1831_v46, %v522_v34  ;;  %v1955_v51 = vadd.f32 %v846_v35, %v825_v38  ;;  %v834_v8 = vld [vmem:[#allocation2 + $0xa] sm:$0xff]  ;;  %v789_v41 = vld [vmem:[#allocation2 + $0x38] sm:$0xff] }
  0xe0   : > { %v853_v2 = vmul.f32 %v1918_v18, %v840_v44  ;;  %v1969_v5 = vmul.f32 %v1913_v15, %v957_v50  ;;  %774 = vst.msk [vmem:[#allocation2 + $0x40] sm:$0xff] %vm765_vm1, %v755_v59  ;;  %v615_v46 = vmul.f32 %v597_v61, %v543_v10  ;;  %v818_v6 = vmul.f32 %v1894_v7, %v805_v42  ;;  %v837_v21 = vld [vmem:[#allocation2 + $0x32] sm:$0xff]  ;;  %v958_v50 = vld [vmem:[#allocation2 + $0x80] sm:$0xff] }
  0xe1   : > { %v606_v9 = vmul.f32 %v588_v62, %v534_v11  ;;  %v593_v29 = vmin.f32 %v575_v39, 6.0  ;;  %v562_v12 = vadd.f32 3.0, %v544_v0  ;;  %v832_v16 = vadd.f32 %v824_v56, %v803_v28 }
  0xe2   : > { %2273 = vst [vmem:[#allocation15_spill] sm:$0xff] %v1969_v5  ;;  %v1974_v17 = vmul.f32 %v1942_v57, %v811_v36  ;;  %v1977_v19 = vmul.f32 %v1947_v58, %v840_v44  ;;  %v633_v20 = vmul.f32 0.16666667, %v615_v46  ;;  %v821_v45 = vmul.f32 %v1894_v7, %v808_v4 }
  0xe3   : > { %v624_v22 = vmul.f32 0.16666667, %v606_v9  ;;  %v611_v10 = vmul.f32 %v593_v29, %v539_v26  ;;  %v580_v24 = vmax.f32 %v562_v12, 0.0  ;;  %v1981_v25 = vmul.f32 %v1961_v3, %v811_v36 }
  0xe4   : > { %v1984_v11 = vmul.f32 %v1966_v60, %v840_v44  ;;  %v847_v27 = vmul.f32 %v1918_v18, %v834_v8  ;;  %v760_v28 = vmul.f32 %v1863_v1, %v633_v20  ;;  %v826_v31 = vadd.f32 %v818_v6, %v797_v33  ;;  %v986_v33 = vld [vmem:[#allocation2 + $0x79] sm:$0xff] }
  0xe5   : > { %v751_v35 = vmul.f32 %v1815_v40, %v624_v22  ;;  %v629_v37 = vmul.f32 0.16666667, %v611_v10  ;;  %v598_v38 = vmin.f32 %v580_v24, 6.0  ;;  %v861_v48 = vadd.f32 %v853_v2, %v832_v16  ;;  %v987_v2 = vld [vmem:[#allocation2 + $0x81] sm:$0xff] }
  0xe6   : > { %v801_v49 = vmul.f32 %v1903_v13, %v789_v41  ;;  %v850_v26 = vmul.f32 %v1918_v18, %v837_v21  ;;  %v1992_v36 = vmul.f32 %v1908_v14, %v789_v41  ;;  %v786_v44 = vld [vmem:[#allocation2 + $0x18] sm:$0xff]  ;;  %779 = vst.msk [vmem:[#allocation2 + $0x68] sm:$0xff] %vm765_vm1, %v760_v28  ;;  %v829_v52 = vadd.f32 %v821_v45, %v800_v47  ;;  %v869_v47 = vld [vmem:[#allocation2 + $0x60] sm:$0xff] }
  0xe7   : > { %v1996_v1 = vmul.f32 %v1942_v57, %v808_v4  ;;  %v809_v40 = vld [vmem:[#allocation2 + $0x39] sm:$0xff]  ;;  %770 = vst.msk [vmem:[#allocation2 + $0x20] sm:$0xff] %vm765_vm1, %v751_v35  ;;  %v756_v54 = vmul.f32 %v1843_v63, %v629_v37  ;;  %v616_v34 = vmul.f32 %v598_v38, %v544_v0  ;;  %v2001_v56 = vmul.f32 %v1947_v58, %v837_v21 }
  0xe8   : > { %v838_v53 = vld [vmem:[#allocation2 + $0x3a] sm:$0xff]  ;;  %v2004_v42 = vmul.f32 %v1913_v15, %v789_v41  ;;  %v2007_v59 = vmul.f32 %v1961_v3, %v808_v4  ;;  %v822_v61 = vmul.f32 %v1894_v7, %v809_v40  ;;  %v855_v62 = vadd.f32 %v847_v27, %v826_v31 }
  0xe9   : > { %v2011_v39 = vmul.f32 %v1966_v60, %v837_v21  ;;  %v876_v63 = vmul.f32 %v1908_v14, %v786_v44  ;;  %775 = vst.msk [vmem:[#allocation2 + $0x48] sm:$0xff] %vm765_vm1, %v756_v54  ;;  %v634_v0 = vmul.f32 0.16666667, %v616_v34  ;;  %v2016_v46 = vmul.f32 %v1913_v15, %v958_v50 }
  0xea   : > { %v2019_v6 = vmul.f32 %v1961_v3, %v986_v33  ;;  %v830_v4 = vadd.f32 %v822_v61, %v801_v49  ;;  %v851_v8 = vmul.f32 %v1918_v18, %v838_v53  ;;  %v2022_v9 = vadd.f32 %v850_v26, %v829_v52 }
  0xeb   : > { %2274 = vst [vmem:[#allocation16_spill] sm:$0xff] %v2016_v46  ;;  %v2025_v29 = vmul.f32 %v1908_v14, %v869_v47  ;;  %v2028_v12 = vmul.f32 %v1913_v15, %v869_v47  ;;  %v761_v16 = vmul.f32 %v1875_v23, %v634_v0  ;;  %v2032_v20 = vmul.f32 %v1961_v3, %v987_v2 }
  0xec   : > { %2275 = vst [vmem:[#allocation17_spill] sm:$0xff] %v2019_v6  ;;  %v798_v41 = vmul.f32 %v1903_v13, %v786_v44  ;;  %v859_v45 = vadd.f32 %v851_v8, %v830_v4  ;;  %v908_v21 = vmul.f32 %v1942_v57, %v809_v40  ;;  %v884_v22 = vadd.f32 %v876_v63, %v1955_v51 }
  0xed   : > { %2276 = vst [vmem:[#allocation18_spill] sm:$0xff] %v2032_v20  ;;  %v2038_v10 = vmul.f32 %v1947_v58, %v838_v53  ;;  %v2041_v24 = vmul.f32 %v1961_v3, %v809_v40  ;;  %v2044_v27 = vmul.f32 %v1966_v60, %v838_v53  ;;  %v870_v23 = vld [vmem:[#allocation2 + $0x68] sm:$0xff] }
  0xee   : > { %v898_v28 = vld [vmem:[#allocation2 + $0x61] sm:$0xff]  ;;  %780 = vst.msk [vmem:[#allocation2 + $0x70] sm:$0xff] %vm765_vm1, %v761_v16  ;;  %v889_v35 = vadd.f32 %v1925_v30, %v859_v45  ;;  %v883_v37 = vmul.f32 %v1908_v14, %v870_v23  ;;  %v806_v26 = vld [vmem:[#allocation2 + $0x19] sm:$0xff]  ;;  %v969_v44 = vmul.f32 %v1913_v15, %v870_v23 }
  0xef   : > { %v927_v31 = vld [vmem:[#allocation2 + $0x62] sm:$0xff]  ;;  %v2050_v51 = vmul.f32 %v1942_v57, %v898_v28  ;;  %v2057_v52 = vmul.f32 %v1961_v3, %v898_v28  ;;  %v835_v40 = vld [vmem:[#allocation2 + $0x1a] sm:$0xff]  ;;  %v819_v47 = vmul.f32 %v1894_v7, %v806_v26  ;;  %v905_v4 = vmul.f32 %v1942_v57, %v806_v26 }
  0xf0   : > { %v2053_v38 = vmul.f32 %v1947_v58, %v927_v31  ;;  %v787_v49 = vld [vmem:[#allocation2 + $0x20] sm:$0xff]  ;;  %v2060_v33 = vmul.f32 %v1966_v60, %v927_v31  ;;  %v891_v54 = vadd.f32 %v883_v37, %v861_v48  ;;  %v918_v34 = vadd.f32 %v1974_v17, %v889_v35  ;;  %v790_v8 = vld [vmem:[#allocation2 + $0x48] sm:$0xff] }
  0xf1   : > { %v807_v50 = vld [vmem:[#allocation2 + $0x21] sm:$0xff]  ;;  %v799_v30 = vmul.f32 %v1903_v13, %v787_v49  ;;  %v848_v2 = vmul.f32 %v1918_v18, %v835_v40  ;;  %v877_v0 = vmul.f32 %v1908_v14, %v787_v49  ;;  %v827_v45 = vadd.f32 %v819_v47, %v798_v41  ;;  %v810_v17 = vld [vmem:[#allocation2 + $0x49] sm:$0xff] }
  0xf2   : > { %2277 = vst [vmem:[#allocation19_spill] sm:$0xff] %v2060_v33  ;;  %v836_v53 = vld [vmem:[#allocation2 + $0x22] sm:$0xff]  ;;  %v820_v61 = vmul.f32 %v1894_v7, %v807_v50  ;;  %v947_v16 = vadd.f32 %v1977_v19, %v918_v34  ;;  %v906_v48 = vmul.f32 %v1942_v57, %v807_v50  ;;  %v839_v28 = vld [vmem:[#allocation2 + $0x4a] sm:$0xff]  ;;  %v913_v35 = vadd.f32 %v905_v4, %v884_v22 }
  0xf3   : > { %v849_v63 = vmul.f32 %v1918_v18, %v836_v53  ;;  %v885_v31 = vadd.f32 %v877_v0, %v855_v62  ;;  %v934_v37 = vmul.f32 %v1947_v58, %v835_v40  ;;  %v935_v20 = vmul.f32 %v1947_v58, %v836_v53 }
  0xf4   : > { %v828_v23 = vadd.f32 %v820_v61, %v799_v30  ;;  %v977_v6 = vadd.f32 %v969_v44, %v947_v16  ;;  %v856_v33 = vadd.f32 %v848_v2, %v827_v45  ;;  %v802_v26 = vmul.f32 %v1903_v13, %v790_v8 }
  0xf5   : > { %v914_v46 = vadd.f32 %v906_v48, %v885_v31  ;;  %v942_v5 = vadd.f32 %v934_v37, %v913_v35  ;;  %v823_v19 = vmul.f32 %v1894_v7, %v810_v17  ;;  %v852_v41 = vmul.f32 %v1918_v18, %v839_v28 }
  0xf6   : > { %v857_v49 = vadd.f32 %v849_v63, %v828_v23  ;;  %v886_v50 = vadd.f32 %v1936_v55, %v856_v33  ;;  %v880_v22 = vmul.f32 %v1908_v14, %v790_v8  ;;  %v909_v30 = vmul.f32 %v1942_v57, %v810_v17  ;;  %v899_v55 = vld [vmem:[#allocation2 + $0x69] sm:$0xff] }
  0xf7   : > { %v943_v40 = vadd.f32 %v935_v20, %v914_v46  ;;  %v972_v44 = vadd.f32 %v1951_v43, %v942_v5  ;;  %v831_v53 = vadd.f32 %v823_v19, %v802_v26  ;;  %v938_v13 = vmul.f32 %v1947_v58, %v839_v28  ;;  %v1411_v46 = vld [vmem:[%s2239_s6] ss:$0 sm:$0xff]  ;;  %v928_v20 = vld [vmem:[#allocation2 + $0x6a] sm:$0xff] }
  0xf8   : > { %v887_v62 = vadd.f32 %v1992_v36, %v857_v49  ;;  %v888_v47 = vadd.f32 %v880_v22, %v2022_v9  ;;  %v915_v7 = vadd.f32 %v1996_v1, %v886_v50  ;;  %v966_v18 = vmul.f32 %v1913_v15, %v790_v8  ;;  %v2282_v22 = vld [vmem:[#allocation18_spill] sm:$0xff] }
  0xf9   : > { %v973_v36 = vadd.f32 %v2004_v42, %v943_v40  ;;  %v1001_v14 = vadd.f32 %v2007_v59, %v972_v44  ;;  %v860_v43 = vadd.f32 %v852_v41, %v831_v53  ;;  %v995_v5 = vmul.f32 %v1961_v3, %v810_v17  ;;  %v1412_v59 = vld [vmem:[%s2240_s7] ss:$0 sm:$0xff]  ;;  %v2280_v41 = vld [vmem:[#allocation19_spill] sm:$0xff] }
  0xfa   : > { %v916_v34 = vadd.f32 %v908_v21, %v887_v62  ;;  %v917_v9 = vadd.f32 %v909_v30, %v888_v47  ;;  %v944_v1 = vadd.f32 %v2001_v56, %v915_v7  ;;  %v1024_v15 = vmul.f32 %v1966_v60, %v839_v28 }
  0xfb   : > { %v1002_v33 = vadd.f32 %v2041_v24, %v973_v36  ;;  %v1030_v42 = vadd.f32 %v2011_v39, %v1001_v14  ;;  %v890_v61 = vadd.f32 %v2025_v29, %v860_v43  ;;  %v912_v2 = vmul.f32 %v1942_v57, %v899_v55  ;;  %v1015_v57 = vld [vmem:[#allocation2 + $0x7a] sm:$0xff] }
  0xfc   : > { %v945_v21 = vadd.f32 %v2038_v10, %v916_v34  ;;  %v946_v10 = vadd.f32 %v938_v13, %v917_v9  ;;  %v974_v0 = vadd.f32 %v966_v18, %v944_v1  ;;  %v941_v56 = vmul.f32 %v1947_v58, %v928_v20  ;;  %v1016_v58 = vld [vmem:[#allocation2 + $0x82] sm:$0xff] }
  0xfd   : > { %v1031_v4 = vadd.f32 %v2044_v27, %v1002_v33  ;;  %v1042_v8 = vmul.f32 %v1411_v46, %v1030_v42  ;;  %v919_v24 = vadd.f32 %v2050_v51, %v890_v61  ;;  %v920_v39 = vadd.f32 %v912_v2, %v891_v54 }
  0xfe   : > { %v975_v63 = vadd.f32 %v1928_v32, %v945_v21  ;;  %v976_v45 = vadd.f32 %v2028_v12, %v946_v10  ;;  %v1003_v23 = vadd.f32 %v995_v5, %v974_v0  ;;  %v998_v29 = vmul.f32 %v1961_v3, %v899_v55  ;;  %v2279_v12 = vld [vmem:[#allocation16_spill] sm:$0xff] }
  0xff   : > { %v1043_v48 = vmul.f32 %v1411_v46, %v1031_v4  ;;  %v1054_v32 = vadd.f32 %v1412_v59, %v1042_v8  ;;  %v948_v17 = vadd.f32 %v2053_v38, %v919_v24  ;;  %v949_v28 = vadd.f32 %v941_v56, %v920_v39 }
 0x100   : > { %v1004_v16 = vadd.f32 %v1981_v25, %v975_v63  ;;  %v1005_v31 = vadd.f32 %v2057_v52, %v976_v45  ;;  %v1032_v51 = vadd.f32 %v1024_v15, %v1003_v23  ;;  %v1006_v54 = vadd.f32 %v998_v29, %v977_v6  ;;  %v2278_v25 = vld [vmem:[#allocation15_spill] sm:$0xff] }
 0x101   : > { %v1055_v35 = vadd.f32 %v1412_v59, %v1043_v48  ;;  %v978_v37 = vadd.f32 %v2278_v25, %v948_v17  ;;  %v979_v49 = vadd.f32 %v2279_v12, %v949_v28  ;;  %v1027_v3 = vmul.f32 %v1966_v60, %v928_v20 }
 0x102   : > { %v1033_v27 = vadd.f32 %v1984_v11, %v1004_v16  ;;  %v1028_v26 = vmul.f32 %v1966_v60, %v1015_v57  ;;  %v1034_v38 = vadd.f32 %v2280_v41, %v1005_v31  ;;  %v1044_v50 = vmul.f32 %v1411_v46, %v1032_v51  ;;  %v2281_v11 = vld [vmem:[#allocation17_spill] sm:$0xff] }
 0x103   : > { %v1029_v62 = vmul.f32 %v1966_v60, %v1016_v58  ;;  %v1007_v52 = vadd.f32 %v2281_v11, %v978_v37  ;;  %v1008_v6 = vadd.f32 %v2282_v22, %v979_v49  ;;  %v1035_v30 = vadd.f32 %v1027_v3, %v1006_v54 }
 0x104   : > { %v1045_v19 = vmul.f32 %v1411_v46, %v1033_v27  ;;  %v1046_v44 = vmul.f32 %v1411_v46, %v1034_v38  ;;  %v1056_v53 = vadd.f32 %v1412_v59, %v1044_v50 }
 0x105   : > { %v1036_v13 = vadd.f32 %v1028_v26, %v1007_v52  ;;  %v1037_v34 = vadd.f32 %v1029_v62, %v1008_v6  ;;  %v1047_v47 = vmul.f32 %v1411_v46, %v1035_v30  ;;  %1065 = sbr.rel (%p1280_p5) target bundleno = 268 (0x10c), region = 56 }
 0x106   : > { %v1057_v40 = vadd.f32 %v1412_v59, %v1045_v19  ;;  %v1058_v7 = vadd.f32 %v1412_v59, %v1046_v44 }
 0x107   : > { %v1048_v18 = vmul.f32 %v1411_v46, %v1036_v13  ;;  %v1049_v55 = vmul.f32 %v1411_v46, %v1037_v34  ;;  %v1059_v36 = vadd.f32 %v1412_v59, %v1047_v47 }
 0x109   : > { %v1060_v14 = vadd.f32 %v1412_v59, %v1048_v18  ;;  %v1061_v43 = vadd.f32 %v1412_v59, %v1049_v55 }
 0x10a   : > { %vm1066_vm2 = vcmask 122880   ;;  %v1566_v60 = vmov 0.0  }
 0x10b   : > { %1067 = vst.msk [vmem:[%s2125_s25] sm:$0x1] %vm1066_vm2, %v1566_v60 }
 0x10c PF: > { %v1069_v46 = vsel %vm765_vm1, %v1054_v32, 0.0  ;;  %v1070_v5 = vsel %vm765_vm1, %v1055_v35, 0.0  ;;  %v1072_v20 = vsel %vm765_vm1, %v1056_v53, 0.0  ;;  %1093 = vst.msk [vmem:[%s2121_s18] sm:$0xff] %vm765_vm1, %v1054_v32  ;;  %s1288_s24 = sshll.u32 %s1547_s15, 3  ;;  %v1074_v9 = vsel %vm765_vm1, %v1057_v40, 0.0 }
 0x10d   : > { %v1071_v21 = vadd.f32 %v1070_v5, %v1069_v46  ;;  %1094 = vst.msk [vmem:[%s2121_s18 + $0x8] sm:$0xff] %vm765_vm1, %v1055_v35  ;;  %s1284_s23 = sshll.u32 %s1551_s16, 5  ;;  %s1121_s26 = sshll.u32 %s2121_s18, 4  ;;  %v1076_v15 = vsel %vm765_vm1, %v1058_v7, 0.0  ;;  %v1078_v42 = vsel %vm765_vm1, %v1059_v36, 0.0  ;;  %v1080_v61 = vsel %vm765_vm1, %v1060_v14, 0.0  ;;  %s2145_s26 = int_to_ptr.vmem [resolvable:$true] %s1121_s26 }
 0x10e   : > { %1095 = vst.msk [vmem:[%s2121_s18 + $0x10] sm:$0xff] %vm765_vm1, %v1056_v53  ;;  %s1118_s29 = sadd.s32 %s1288_s24, %s1284_s23  ;;  %s2285_s23 = sand.u32 1, %s1539_s13  }
 0x10f   : > { %v1073_v1 = vadd.f32 %v1072_v20, %v1071_v21  ;;  %1096 = vst.msk [vmem:[%s2121_s18 + $0x18] sm:$0xff] %vm765_vm1, %v1057_v40  ;;  %s1285_s17 = sshll.u32 %s1118_s29, 3  ;;  %s1102_s29 = scalar_lea.sflag [#allocation4], %s2285_s23 }
 0x110   : > { %1097 = vst.msk [vmem:[%s2121_s18 + $0x20] sm:$0xff] %vm765_vm1, %v1058_v7  ;;  %s1120_s0 = scalar_lea.hbm %s2241_s8, %s1285_s17  ;;  %s1433_s22 = scalar_lea.hbm %s2241_s8, 512 }
 0x111   : > { %v1075_v33 = vadd.f32 %v1074_v9, %v1073_v1  ;;  %1098 = vst.msk [vmem:[%s2121_s18 + $0x28] sm:$0xff] %vm765_vm1, %v1059_v36  ;;  %s1123_s24 = sshll.u32 %s1120_s0, 4  ;;  %s1124_s24 = int_to_ptr.hbm [resolvable:$true] %s1123_s24 }
 0x112   : > { %1099 = vst.msk [vmem:[%s2121_s18 + $0x30] sm:$0xff] %vm765_vm1, %v1060_v14  ;;  %s1427_s1 = sshra.s32 %s1124_s24, 4  ;;  %s1428_s1 = int_to_ptr.hbm [resolvable:$true] %s1427_s1 }
 0x113   : > { %v1077_v59 = vadd.f32 %v1076_v15, %v1075_v33  ;;  %1100 = vst.msk [vmem:[%s2121_s18 + $0x38] sm:$0xff] %vm765_vm1, %v1061_v43  ;;  %s1429_s15 = scalar_lea.hbm %s1428_s1, 64  ;;  %p1434_p10 = scmp.lt.s32.totalorder %s1428_s1, %s2241_s8 }
 0x114   : > { %p1430_p6 = scmp.ne.s32.totalorder %s1428_s1, %s1429_s15  ;;  %p1435_p11 = scmp.lt.s32.totalorder %s1433_s22, %s1429_s15 }
 0x115   : > { %v1079_v2 = vadd.f32 %v1078_v42, %v1077_v59 }
 0x116   : > { %p1431_p8 = pnand %p1430_p6, %p1692_p3  ;;  %p1436_p0 = por %p1435_p11, %p1434_p10 }
 0x118   : > { %p1432_p9 = pneg %p1431_p8 }
 0x11a   : > { %p1437_p1 = pnand %p1436_p0, %p1432_p9 }
 0x11c   : > { %1440 = shalt.err (!%p1437_p1)
}
 0x11d   : > { %s1567_s18 = smov 128   ;;  %s1568_s23 = smov 8   ;;  %v1082_v63 = vsel %vm765_vm1, %v1061_v43, 0.0  ;;  %v1081_v10 = vadd.f32 %v1080_v61, %v1079_v2  ;;  %v1068_v16 = vld [vmem:[%s2125_s25] sm:$0x1]  ;;  %vm1091_vm3 = vcmask 122880  }
 0x11e   : > { %1293 = dma.vmem_to_hbm [thread:$0]  (%p1692_p3), %s2145_s26, 1024, %s1124_s24, %s1102_s29, %s1567_s18, %s1567_s18, %s1568_s23  }
 0x11f   : > { %v1083_v0 = vadd.f32 %v1082_v63, %v1081_v10  ;;  %s2286_s3 = sld [smem:[#allocation24_spill]]  ;;  %s1137_s17 = sshll.u32 %s2125_s25, 4  ;;  %s1138_s17 = int_to_ptr.vmem [resolvable:$true] %s1137_s17 }
 0x120   : > { %s2287_s26 = sand.u32 1, %s1527_s10  }
 0x121   : > { %v1084_v56 = vrot.slane %v1083_v0, 4  ;;  %s1107_s24 = scalar_lea.sflag [#allocation6], %s2287_s26 }
 0x123   : > { %v1085_v4 = vadd.f32 %v1084_v56, %v1083_v0 }
 0x125   : > { %v1086_v8 = vrot.slane %v1085_v4, 2  ;;  %s1135_s15 = scalar_lea.hbm %s2286_s3, %s1551_s16  ;;  %s1461_s18 = scalar_lea.hbm %s2286_s3, 2 }
 0x126   : > { %s1139_s28 = sshll.u32 %s1135_s15, 4  ;;  %s1140_s28 = int_to_ptr.hbm [resolvable:$true] %s1139_s28 }
 0x127   : > { %v1087_v24 = vadd.f32 %v1086_v8, %v1085_v4  ;;  %s1455_s29 = sshra.s32 %s1140_s28, 4  ;;  %s1456_s29 = int_to_ptr.hbm [resolvable:$true] %s1455_s29 }
 0x128   : > { %s1457_s0 = scalar_lea.hbm %s1456_s29, 1  ;;  %p1462_p5 = scmp.lt.s32.totalorder %s1456_s29, %s2286_s3 }
 0x129   : > { %v1088_v39 = vrot.slane %v1087_v24, 1  ;;  %p1458_p3 = scmp.ne.s32.totalorder %s1456_s29, %s1457_s0  ;;  %p1463_p6 = scmp.lt.s32.totalorder %s1461_s18, %s1457_s0 }
 0x12b   : > { %v1089_v45 = vadd.f32 %v1088_v39, %v1087_v24  ;;  %p1459_p4 = pnand %p1458_p3, %p1719_p12  ;;  %p1464_p8 = por %p1463_p6, %p1462_p5 }
 0x12d   : > { %v1090_v23 = vadd.f32 %v1089_v45, %v1068_v16  ;;  %p1460_p2 = pneg %p1459_p4 }
 0x12f   : > { %1092 = vst.msk [vmem:[%s2125_s25] sm:$0x1] %vm1091_vm3, %v1090_v23  ;;  %p1465_p9 = pnand %p1464_p8, %p1460_p2 }
 0x131   : > { %1468 = shalt.err (!%p1465_p9)
}
 0x132   : > { %1294 = dma.vmem_to_hbm [thread:$0]  (%p1719_p12), %s1138_s17, 16, %s1140_s28, %s1107_s24  }
 0x133 PF: > { %s2288_s25 = sld [smem:[#allocation9_spill]]  ;;  %p1304_p10 = scmp.ge.s32.totalorder %s1563_s19, 2 }
 0x135   : > { %p1298_p11 = pnand %p1304_p10, %p1707_p7 }
 0x137   : > { %p1299_p0 = pneg %p1298_p11 }
 0x139   : > { %s1151_s2 = sand.u32 1, %s2288_s25  }
 0x13a   : > { %s1152_s15 = scalar_lea.sflag [#allocation4], %s1151_s2 }
 0x13b   : > { %1514 = dma.done.wait (%p1299_p0), %s1152_s15, 1024  }
 0x13c   : > { %1516 = vsyncadd (%p1299_p0), %s1152_s15, 4294966272  ;;  %s1161_s26 = sand.u32 1, %s1523_s30   ;;  %p1301_p1 = pnand %p1304_p10, %p1731_p13 }
 0x13d   : > { %s1162_s21 = scalar_lea.sflag [#allocation6], %s1161_s26 }
 0x13e   : > { %p1302_p3 = pneg %p1301_p1 }
 0x140   : > { %1518 = dma.done.wait (%p1302_p3), %s1162_s21, 16  }
 0x141   : > { %1520 = vsyncadd (%p1302_p3), %s1162_s21, 4294967280  ;;  %s26_s19 = sadd.s32 1, %s1563_s19   ;;  %s2289_s15 = sld [smem:[#allocation10_spill]] }
 0x142   : > { %p23_p12 = scmp.ge.s32.totalorder %s26_s19, 10   ;;  %s2290_s16 = sld [smem:[#allocation11_spill]] }
 0x143   : > { %s2291_s17 = sld [smem:[#allocation12_spill]]  ;;  %s2293_s30 = smov %s1527_s10 }
 0x144   : > { %s2292_s18 = sld [smem:[#allocation14_spill]]  ;;  %s2294_s10 = smov %s1531_s11 }
 0x145   : > { %s2295_s11 = smov %s1724_s12  ;;  %s2296_s12 = smov %s1539_s13 }
 0x146   : > { %s2297_s13 = smov %s1543_s14  ;;  %s2298_s14 = smov %s1727_s9 }
 0x147   :  { %25 = sbr.rel (!%p23_p12) target bundleno = 15 (0xf), region = 120 }
 0x14c   :  { %1167 = vsyncpa [#allocation4], 1 }
 0x14d   :  { %1169 = vsyncpa [#allocation4 + $0x1], 1 }
 0x14e   :  { %1170 = vsyncpa [#allocation6], 1 }
 0x14f   :  { %1172 = vsyncpa [#allocation6 + $0x1], 1 }

</bundles_post_ra>
